<compile_context>
chip_gen: v7x
topology: tpu7x:2x2x1
jax: 0.10.0
libtpu: 0.0.40
codegen_flags: <defaults>
</compile_context>

<pallas_src>
import functools

import numpy as np
import jax
import jax.numpy as jnp
from jax.experimental import pallas as pl
from jax.experimental.pallas import tpu as pltpu

C1 = 8   # padded in-channels of conv1  (real: 1)
C = 16   # padded channels for conv1-out / conv2 / conv3  (real: 10 / 10 / 1)


# ----------------------------------------------------------------------------
# In-kernel helpers
# ----------------------------------------------------------------------------
def _conv3x3_relu(a, w_ref, b_ref, n, mask_l, mask_r):
    """3x3 conv (stride 1, zero pad 1) + bias + ReLU on flattened activations.

    a:      (cin_p, n*n) f32 activation, spatial flattened row-major on lanes.
    w_ref:  (9, cout_p, cin_p) VMEM weights, tap index = kh*3 + kw.
    b_ref:  (cout_p, 1) VMEM bias.
    masks:  (1, n*n) f32, zero out wrapped columns for the dw = -1 / +1 taps.
    """
    cin_p, nn = a.shape
    cout_p = w_ref.shape[1]

    zpad = jnp.zeros((cin_p, n + 1), jnp.float32)
    a_ext = jnp.concatenate([zpad, a, zpad], axis=1)        # (cin_p, nn + 2n + 2)

    acc = jnp.zeros((cout_p, nn), jnp.float32)
    for dh in (-1, 0, 1):
        for dw in (-1, 0, 1):
            off = dh * n + dw
            start = (n + 1) + off
            s = a_ext[:, start:start + nn]                  # shifted plane
            if dw == -1:
                s = s * mask_l                              # drop w == 0 wrap
            elif dw == 1:
                s = s * mask_r                              # drop w == n-1 wrap
            tap = 3 * (dh + 1) + (dw + 1)
            acc = acc + jnp.dot(w_ref[tap], s,
                                preferred_element_type=jnp.float32)
    return jnp.maximum(acc + b_ref[...], 0.0)


def make_net_kernel(n):
    def kernel(x_ref, mask_ref, w1_ref, b1_ref, w2_ref, b2_ref, w3_ref, b3_ref,
               pool_ref, wfc1_ref, bfc1_ref, wfc2_ref, bfc2_ref, o_ref):
        mask_l = mask_ref[0:1, :]                           # (1, n*n)
        mask_r = mask_ref[1:2, :]                           # (1, n*n)

        a = x_ref[0]                                        # (C1, n*n)
        a = _conv3x3_relu(a, w1_ref, b1_ref, n, mask_l, mask_r)   # (C, n*n)
        a = _conv3x3_relu(a, w2_ref, b2_ref, n, mask_l, mask_r)   # (C, n*n)
        a = _conv3x3_relu(a, w3_ref, b3_ref, n, mask_l, mask_r)   # (C, n*n)

        y = a[0:1, :]                                       # real conv3 channel
        # mean over last spatial axis == matmul with the (n*n, n) pooling matrix
        m = jnp.dot(y, pool_ref[...], preferred_element_type=jnp.float32)  # (1, n)
        h = jnp.dot(m, wfc1_ref[...], preferred_element_type=jnp.float32)
        h = jnp.maximum(h + bfc1_ref[...], 0.0)             # relu(fc1)
        out = jnp.sum(h * wfc2_ref[...], axis=1, keepdims=True) + bfc2_ref[...]
        o_ref[...] = out.reshape(1, 1, 1)

    return kernel


# ----------------------------------------------------------------------------
# Host-side weight prep + fused forward
# ----------------------------------------------------------------------------
def _prep_conv(w, b, cin_p, cout_p):
    cout, cin = w.shape[0], w.shape[1]
    wt = jnp.transpose(w.reshape(cout, cin, 9).astype(jnp.float32), (2, 0, 1))
    wt = jnp.pad(wt, ((0, 0), (0, cout_p - cout), (0, cin_p - cin)))
    bp = jnp.pad(b.astype(jnp.float32), (0, cout_p - cout)).reshape(cout_p, 1)
    return wt, bp


@functools.partial(jax.jit, static_argnames=("n_nodi",))
def net_forward(x, params, n_nodi):
    n = n_nodi
    nn = n * n
    B = x.shape[0]
    hidden = params["w_fc1_t"].shape[1]

    x = x.astype(jnp.float32).reshape(B, 1, nn)             # x.float(), flatten hw
    x_p = jnp.pad(x, ((0, 0), (0, C1 - 1), (0, 0)))          # (B, C1, nn)

    w1, b1 = _prep_conv(params["w_conv1"], params["b_conv1"], C1, C)
    w2, b2 = _prep_conv(params["w_conv2"], params["b_conv2"], C, C)
    w3, b3 = _prep_conv(params["w_conv3"], params["b_conv3"], C, C)

    col = jnp.arange(nn, dtype=jnp.int32) % n
    masks = jnp.stack([(col >= 1).astype(jnp.float32),
                       (col <= n - 2).astype(jnp.float32)])  # (2, nn)

    rows = jnp.arange(nn, dtype=jnp.int32) // n
    pool = (rows[:, None] == jnp.arange(n, dtype=jnp.int32)[None, :])
    pool = pool.astype(jnp.float32) * (1.0 / n)              # (nn, n): row-mean

    wfc1 = params["w_fc1_t"].astype(jnp.float32)             # (n, hidden)
    bfc1 = params["b_fc1"].astype(jnp.float32)               # (1, hidden)
    wfc2 = params["w_fc2"].astype(jnp.float32)               # (1, hidden)
    bfc2 = params["b_fc2"].astype(jnp.float32)               # (1, 1)

    out = pl.pallas_call(
        make_net_kernel(n),
        out_shape=jax.ShapeDtypeStruct((B, 1, 1), jnp.float32),
        grid=(B,),
        in_specs=[
            pl.BlockSpec((1, C1, nn), lambda bi: (bi, 0, 0)),   # per-batch input
            pl.BlockSpec((2, nn), lambda bi: (0, 0)),           # column masks
            pl.BlockSpec((9, C, C1), lambda bi: (0, 0, 0)),     # conv1 weights
            pl.BlockSpec((C, 1), lambda bi: (0, 0)),
            pl.BlockSpec((9, C, C), lambda bi: (0, 0, 0)),      # conv2 weights
            pl.BlockSpec((C, 1), lambda bi: (0, 0)),
            pl.BlockSpec((9, C, C), lambda bi: (0, 0, 0)),      # conv3 weights
            pl.BlockSpec((C, 1), lambda bi: (0, 0)),
            pl.BlockSpec((nn, n), lambda bi: (0, 0)),           # mean pooling mat
            pl.BlockSpec((n, hidden), lambda bi: (0, 0)),       # fc1
            pl.BlockSpec((1, hidden), lambda bi: (0, 0)),
            pl.BlockSpec((1, hidden), lambda bi: (0, 0)),       # fc2
            pl.BlockSpec((1, 1), lambda bi: (0, 0)),
        ],
        out_specs=pl.BlockSpec((1, 1, 1), lambda bi: (bi, 0, 0)),
        compiler_params=pltpu.CompilerParams(
            dimension_semantics=("parallel",)),
    )(x_p, masks, w1, b1, w2, b2, w3, b3, pool, wfc1, bfc1, wfc2, bfc2)
    return out.reshape(B, 1)


# ----------------------------------------------------------------------------
# Params + pure-JAX reference
# ----------------------------------------------------------------------------
def init_params(key, n_nodi, hidden=30):
    ks = jax.random.split(key, 10)

    def rn(k, shape, scale):
        return scale * jax.random.normal(k, shape, jnp.float32)

    p = {}
    p["w_conv1"] = rn(ks[0], (10, 1, 3, 3), 0.2)
    p["b_conv1"] = rn(ks[1], (10,), 0.1)
    p["w_conv2"] = rn(ks[2], (10, 10, 3, 3), 0.1)
    p["b_conv2"] = rn(ks[3], (10,), 0.1)
    p["w_conv3"] = rn(ks[4], (1, 10, 3, 3), 0.1)
    p["b_conv3"] = rn(ks[5], (1,), 0.1)
    w_fc1 = rn(ks[6], (hidden, n_nodi), 0.1)                 # torch (out, in)
    p["w_fc1_t"] = jnp.transpose(w_fc1)                      # (n, hidden)
    p["b_fc1"] = rn(ks[7], (hidden,), 0.1).reshape(1, hidden)
    p["w_fc2"] = rn(ks[8], (1, hidden), 0.1)                 # torch (1, hidden)
    p["b_fc2"] = rn(ks[9], (1,), 0.1).reshape(1, 1)
    return p


def reference_forward(x, p, n):
    """Pure-JAX reference mirroring the PyTorch forward."""
    x = x.astype(jnp.float32)

    def conv(a, w, b):
        out = jax.lax.conv_general_dilated(
            a, w, (1, 1), "SAME", dimension_numbers=("NCHW", "OIHW", "NCHW"))
        return jax.nn.relu(out + b.reshape(1, -1, 1, 1))

    a = conv(x, p["w_conv1"], p["b_conv1"])
    a = conv(a, p["w_conv2"], p["b_conv2"])
    a = conv(a, p["w_conv3"], p["b_conv3"])
    y = a.reshape(x.shape[0], n, n)
    m = jnp.mean(y, axis=2)
    h = jax.nn.relu(m @ p["w_fc1_t"] + p["b_fc1"])
    return h @ p["w_fc2"].T + p["b_fc2"]


if __name__ == "__main__":
    n_nodi = 16     # small stand-in for the original 75 (Linear in_features)
    bs = 2
    key = jax.random.PRNGKey(0)
    kx, kp = jax.random.split(key)

    x = jax.random.uniform(kx, (bs, 1, n_nodi, n_nodi), jnp.float32)
    params = init_params(kp, n_nodi)

    out = net_forward(x, params, n_nodi)
    out = jax.block_until_ready(out)
    assert out.shape == (bs, 1)

    ref = reference_forward(x, params, n_nodi)
    np.testing.assert_allclose(np.asarray(out), np.asarray(ref), rtol=2e-3, atol=2e-3)

    print("KERNEL_OK")
</pallas_src>

<mosaic_0001>
module attributes {stable_mosaic.version = 11 : i64} {
  func.func @kernel(%arg0: i32, %arg1: memref<1x8x256xf32, #tpu.memory_space<vmem>>, %arg2: memref<2x256xf32, #tpu.memory_space<vmem>>, %arg3: memref<9x16x8xf32, #tpu.memory_space<vmem>>, %arg4: memref<16x1xf32, #tpu.memory_space<vmem>>, %arg5: memref<9x16x16xf32, #tpu.memory_space<vmem>>, %arg6: memref<16x1xf32, #tpu.memory_space<vmem>>, %arg7: memref<9x16x16xf32, #tpu.memory_space<vmem>>, %arg8: memref<16x1xf32, #tpu.memory_space<vmem>>, %arg9: memref<256x16xf32, #tpu.memory_space<vmem>>, %arg10: memref<16x30xf32, #tpu.memory_space<vmem>>, %arg11: memref<1x30xf32, #tpu.memory_space<vmem>>, %arg12: memref<1x30xf32, #tpu.memory_space<vmem>>, %arg13: memref<1x1xf32, #tpu.memory_space<vmem>>, %arg14: memref<1x1x1xf32, #tpu.memory_space<vmem>>) attributes {dimension_semantics = [#tpu.dimension_semantics<parallel>], iteration_bounds = array<i64: 2>, scalar_prefetch = 0 : i64, scratch_operands = 0 : i64, tpu.core_type = #tpu.core_type<tc>, window_params = [{transform_indices = @transform_0, window_bounds = array<i64: 1, 8, 256>}, {pipeline_mode = #tpu.pipeline_mode<synchronous>, transform_indices = @transform_1, window_bounds = array<i64: 2, 256>}, {pipeline_mode = #tpu.pipeline_mode<synchronous>, transform_indices = @transform_2, window_bounds = array<i64: 9, 16, 8>}, {pipeline_mode = #tpu.pipeline_mode<synchronous>, transform_indices = @transform_3, window_bounds = array<i64: 16, 1>}, {pipeline_mode = #tpu.pipeline_mode<synchronous>, transform_indices = @transform_4, window_bounds = array<i64: 9, 16, 16>}, {pipeline_mode = #tpu.pipeline_mode<synchronous>, transform_indices = @transform_5, window_bounds = array<i64: 16, 1>}, {pipeline_mode = #tpu.pipeline_mode<synchronous>, transform_indices = @transform_6, window_bounds = array<i64: 9, 16, 16>}, {pipeline_mode = #tpu.pipeline_mode<synchronous>, transform_indices = @transform_7, window_bounds = array<i64: 16, 1>}, {pipeline_mode = #tpu.pipeline_mode<synchronous>, transform_indices = @transform_8, window_bounds = array<i64: 256, 16>}, {pipeline_mode = #tpu.pipeline_mode<synchronous>, transform_indices = @transform_9, window_bounds = array<i64: 16, 30>}, {pipeline_mode = #tpu.pipeline_mode<synchronous>, transform_indices = @transform_10, window_bounds = array<i64: 1, 30>}, {pipeline_mode = #tpu.pipeline_mode<synchronous>, transform_indices = @transform_11, window_bounds = array<i64: 1, 30>}, {pipeline_mode = #tpu.pipeline_mode<synchronous>, transform_indices = @transform_12, window_bounds = array<i64: 1, 1>}, {transform_indices = @transform_13, window_bounds = array<i64: 1, 1, 1>}]} {
    %c0 = arith.constant 0 : index
    %c0_0 = arith.constant 0 : index
    %0 = vector.load %arg2[%c0, %c0_0] : memref<2x256xf32, #tpu.memory_space<vmem>>, vector<1x256xf32>
    %c1 = arith.constant 1 : index
    %c0_1 = arith.constant 0 : index
    %1 = vector.load %arg2[%c1, %c0_1] : memref<2x256xf32, #tpu.memory_space<vmem>>, vector<1x256xf32>
    %c0_2 = arith.constant 0 : index
    %c0_3 = arith.constant 0 : index
    %c0_4 = arith.constant 0 : index
    %2 = vector.load %arg1[%c0_2, %c0_3, %c0_4] : memref<1x8x256xf32, #tpu.memory_space<vmem>>, vector<1x8x256xf32>
    %3 = vector.shape_cast %2 : vector<1x8x256xf32> to vector<8x256xf32>
    %cst = arith.constant 0.000000e+00 : f32
    %4 = vector.broadcast %cst : f32 to vector<8x17xf32>
    %5 = tpu.concatenate %4, %3, %4 in 1 : vector<8x17xf32>, vector<8x256xf32>, vector<8x17xf32> -> vector<8x290xf32>
    %cst_5 = arith.constant 0.000000e+00 : f32
    %6 = vector.broadcast %cst_5 : f32 to vector<16x256xf32>
    %7 = vector.extract_strided_slice %5 {offsets = [0, 0], sizes = [8, 256], strides = [1, 1]} : vector<8x290xf32> to vector<8x256xf32>
    %8 = vector.broadcast %0 : vector<1x256xf32> to vector<8x256xf32>
    %9 = arith.mulf %7, %8 : vector<8x256xf32>
    %c0_6 = arith.constant 0 : index
    %c0_7 = arith.constant 0 : index
    %c0_8 = arith.constant 0 : index
    %10 = vector.load %arg3[%c0_6, %c0_7, %c0_8] : memref<9x16x8xf32, #tpu.memory_space<vmem>>, vector<1x16x8xf32>
    %11 = vector.shape_cast %10 : vector<1x16x8xf32> to vector<16x8xf32>
    %cst_9 = arith.constant dense<0.000000e+00> : vector<16x256xf32>
    %12 = tpu.matmul %11, %9, %cst_9 {dimension_numbers = #tpu.dot_dimension_numbers<[1], [0], [0], [1], [0, 0, 1, 1], [], []>} : vector<16x8xf32>, vector<8x256xf32>, vector<16x256xf32> -> vector<16x256xf32>
    %13 = arith.addf %6, %12 : vector<16x256xf32>
    %14 = vector.extract_strided_slice %5 {offsets = [0, 1], sizes = [8, 256], strides = [1, 1]} : vector<8x290xf32> to vector<8x256xf32>
    %c1_10 = arith.constant 1 : index
    %c0_11 = arith.constant 0 : index
    %c0_12 = arith.constant 0 : index
    %15 = vector.load %arg3[%c1_10, %c0_11, %c0_12] : memref<9x16x8xf32, #tpu.memory_space<vmem>>, vector<1x16x8xf32>
    %16 = vector.shape_cast %15 : vector<1x16x8xf32> to vector<16x8xf32>
    %cst_13 = arith.constant dense<0.000000e+00> : vector<16x256xf32>
    %17 = tpu.matmul %16, %14, %cst_13 {dimension_numbers = #tpu.dot_dimension_numbers<[1], [0], [0], [1], [0, 0, 1, 1], [], []>} : vector<16x8xf32>, vector<8x256xf32>, vector<16x256xf32> -> vector<16x256xf32>
    %18 = arith.addf %13, %17 : vector<16x256xf32>
    %19 = vector.extract_strided_slice %5 {offsets = [0, 2], sizes = [8, 256], strides = [1, 1]} : vector<8x290xf32> to vector<8x256xf32>
    %20 = vector.broadcast %1 : vector<1x256xf32> to vector<8x256xf32>
    %21 = arith.mulf %19, %20 : vector<8x256xf32>
    %c2 = arith.constant 2 : index
    %c0_14 = arith.constant 0 : index
    %c0_15 = arith.constant 0 : index
    %22 = vector.load %arg3[%c2, %c0_14, %c0_15] : memref<9x16x8xf32, #tpu.memory_space<vmem>>, vector<1x16x8xf32>
    %23 = vector.shape_cast %22 : vector<1x16x8xf32> to vector<16x8xf32>
    %cst_16 = arith.constant dense<0.000000e+00> : vector<16x256xf32>
    %24 = tpu.matmul %23, %21, %cst_16 {dimension_numbers = #tpu.dot_dimension_numbers<[1], [0], [0], [1], [0, 0, 1, 1], [], []>} : vector<16x8xf32>, vector<8x256xf32>, vector<16x256xf32> -> vector<16x256xf32>
    %25 = arith.addf %18, %24 : vector<16x256xf32>
    %26 = vector.extract_strided_slice %5 {offsets = [0, 16], sizes = [8, 256], strides = [1, 1]} : vector<8x290xf32> to vector<8x256xf32>
    %27 = vector.broadcast %0 : vector<1x256xf32> to vector<8x256xf32>
    %28 = arith.mulf %26, %27 : vector<8x256xf32>
    %c3 = arith.constant 3 : index
    %c0_17 = arith.constant 0 : index
    %c0_18 = arith.constant 0 : index
    %29 = vector.load %arg3[%c3, %c0_17, %c0_18] : memref<9x16x8xf32, #tpu.memory_space<vmem>>, vector<1x16x8xf32>
    %30 = vector.shape_cast %29 : vector<1x16x8xf32> to vector<16x8xf32>
    %cst_19 = arith.constant dense<0.000000e+00> : vector<16x256xf32>
    %31 = tpu.matmul %30, %28, %cst_19 {dimension_numbers = #tpu.dot_dimension_numbers<[1], [0], [0], [1], [0, 0, 1, 1], [], []>} : vector<16x8xf32>, vector<8x256xf32>, vector<16x256xf32> -> vector<16x256xf32>
    %32 = arith.addf %25, %31 : vector<16x256xf32>
    %33 = vector.extract_strided_slice %5 {offsets = [0, 17], sizes = [8, 256], strides = [1, 1]} : vector<8x290xf32> to vector<8x256xf32>
    %c4 = arith.constant 4 : index
    %c0_20 = arith.constant 0 : index
    %c0_21 = arith.constant 0 : index
    %34 = vector.load %arg3[%c4, %c0_20, %c0_21] : memref<9x16x8xf32, #tpu.memory_space<vmem>>, vector<1x16x8xf32>
    %35 = vector.shape_cast %34 : vector<1x16x8xf32> to vector<16x8xf32>
    %cst_22 = arith.constant dense<0.000000e+00> : vector<16x256xf32>
    %36 = tpu.matmul %35, %33, %cst_22 {dimension_numbers = #tpu.dot_dimension_numbers<[1], [0], [0], [1], [0, 0, 1, 1], [], []>} : vector<16x8xf32>, vector<8x256xf32>, vector<16x256xf32> -> vector<16x256xf32>
    %37 = arith.addf %32, %36 : vector<16x256xf32>
    %38 = vector.extract_strided_slice %5 {offsets = [0, 18], sizes = [8, 256], strides = [1, 1]} : vector<8x290xf32> to vector<8x256xf32>
    %39 = vector.broadcast %1 : vector<1x256xf32> to vector<8x256xf32>
    %40 = arith.mulf %38, %39 : vector<8x256xf32>
    %c5 = arith.constant 5 : index
    %c0_23 = arith.constant 0 : index
    %c0_24 = arith.constant 0 : index
    %41 = vector.load %arg3[%c5, %c0_23, %c0_24] : memref<9x16x8xf32, #tpu.memory_space<vmem>>, vector<1x16x8xf32>
    %42 = vector.shape_cast %41 : vector<1x16x8xf32> to vector<16x8xf32>
    %cst_25 = arith.constant dense<0.000000e+00> : vector<16x256xf32>
    %43 = tpu.matmul %42, %40, %cst_25 {dimension_numbers = #tpu.dot_dimension_numbers<[1], [0], [0], [1], [0, 0, 1, 1], [], []>} : vector<16x8xf32>, vector<8x256xf32>, vector<16x256xf32> -> vector<16x256xf32>
    %44 = arith.addf %37, %43 : vector<16x256xf32>
    %45 = vector.extract_strided_slice %5 {offsets = [0, 32], sizes = [8, 256], strides = [1, 1]} : vector<8x290xf32> to vector<8x256xf32>
    %46 = vector.broadcast %0 : vector<1x256xf32> to vector<8x256xf32>
    %47 = arith.mulf %45, %46 : vector<8x256xf32>
    %c6 = arith.constant 6 : index
    %c0_26 = arith.constant 0 : index
    %c0_27 = arith.constant 0 : index
    %48 = vector.load %arg3[%c6, %c0_26, %c0_27] : memref<9x16x8xf32, #tpu.memory_space<vmem>>, vector<1x16x8xf32>
    %49 = vector.shape_cast %48 : vector<1x16x8xf32> to vector<16x8xf32>
    %cst_28 = arith.constant dense<0.000000e+00> : vector<16x256xf32>
    %50 = tpu.matmul %49, %47, %cst_28 {dimension_numbers = #tpu.dot_dimension_numbers<[1], [0], [0], [1], [0, 0, 1, 1], [], []>} : vector<16x8xf32>, vector<8x256xf32>, vector<16x256xf32> -> vector<16x256xf32>
    %51 = arith.addf %44, %50 : vector<16x256xf32>
    %52 = vector.extract_strided_slice %5 {offsets = [0, 33], sizes = [8, 256], strides = [1, 1]} : vector<8x290xf32> to vector<8x256xf32>
    %c7 = arith.constant 7 : index
    %c0_29 = arith.constant 0 : index
    %c0_30 = arith.constant 0 : index
    %53 = vector.load %arg3[%c7, %c0_29, %c0_30] : memref<9x16x8xf32, #tpu.memory_space<vmem>>, vector<1x16x8xf32>
    %54 = vector.shape_cast %53 : vector<1x16x8xf32> to vector<16x8xf32>
    %cst_31 = arith.constant dense<0.000000e+00> : vector<16x256xf32>
    %55 = tpu.matmul %54, %52, %cst_31 {dimension_numbers = #tpu.dot_dimension_numbers<[1], [0], [0], [1], [0, 0, 1, 1], [], []>} : vector<16x8xf32>, vector<8x256xf32>, vector<16x256xf32> -> vector<16x256xf32>
    %56 = arith.addf %51, %55 : vector<16x256xf32>
    %57 = vector.extract_strided_slice %5 {offsets = [0, 34], sizes = [8, 256], strides = [1, 1]} : vector<8x290xf32> to vector<8x256xf32>
    %58 = vector.broadcast %1 : vector<1x256xf32> to vector<8x256xf32>
    %59 = arith.mulf %57, %58 : vector<8x256xf32>
    %c8 = arith.constant 8 : index
    %c0_32 = arith.constant 0 : index
    %c0_33 = arith.constant 0 : index
    %60 = vector.load %arg3[%c8, %c0_32, %c0_33] : memref<9x16x8xf32, #tpu.memory_space<vmem>>, vector<1x16x8xf32>
    %61 = vector.shape_cast %60 : vector<1x16x8xf32> to vector<16x8xf32>
    %cst_34 = arith.constant dense<0.000000e+00> : vector<16x256xf32>
    %62 = tpu.matmul %61, %59, %cst_34 {dimension_numbers = #tpu.dot_dimension_numbers<[1], [0], [0], [1], [0, 0, 1, 1], [], []>} : vector<16x8xf32>, vector<8x256xf32>, vector<16x256xf32> -> vector<16x256xf32>
    %63 = arith.addf %56, %62 : vector<16x256xf32>
    %c0_35 = arith.constant 0 : index
    %c0_36 = arith.constant 0 : index
    %64 = vector.load %arg4[%c0_35, %c0_36] : memref<16x1xf32, #tpu.memory_space<vmem>>, vector<16x1xf32>
    %65 = vector.broadcast %64 : vector<16x1xf32> to vector<16x256xf32>
    %66 = arith.addf %63, %65 : vector<16x256xf32>
    %cst_37 = arith.constant 0.000000e+00 : f32
    %67 = vector.broadcast %cst_37 : f32 to vector<16x256xf32>
    %68 = arith.maximumf %66, %67 : vector<16x256xf32>
    %cst_38 = arith.constant 0.000000e+00 : f32
    %69 = vector.broadcast %cst_38 : f32 to vector<16x17xf32>
    %70 = tpu.concatenate %69, %68, %69 in 1 : vector<16x17xf32>, vector<16x256xf32>, vector<16x17xf32> -> vector<16x290xf32>
    %cst_39 = arith.constant 0.000000e+00 : f32
    %71 = vector.broadcast %cst_39 : f32 to vector<16x256xf32>
    %72 = vector.extract_strided_slice %70 {offsets = [0, 0], sizes = [16, 256], strides = [1, 1]} : vector<16x290xf32> to vector<16x256xf32>
    %73 = vector.broadcast %0 : vector<1x256xf32> to vector<16x256xf32>
    %74 = arith.mulf %72, %73 : vector<16x256xf32>
    %c0_40 = arith.constant 0 : index
    %c0_41 = arith.constant 0 : index
    %c0_42 = arith.constant 0 : index
    %75 = vector.load %arg5[%c0_40, %c0_41, %c0_42] : memref<9x16x16xf32, #tpu.memory_space<vmem>>, vector<1x16x16xf32>
    %76 = vector.shape_cast %75 : vector<1x16x16xf32> to vector<16x16xf32>
    %cst_43 = arith.constant dense<0.000000e+00> : vector<16x256xf32>
    %77 = tpu.matmul %76, %74, %cst_43 {dimension_numbers = #tpu.dot_dimension_numbers<[1], [0], [0], [1], [0, 0, 1, 1], [], []>} : vector<16x16xf32>, vector<16x256xf32>, vector<16x256xf32> -> vector<16x256xf32>
    %78 = arith.addf %71, %77 : vector<16x256xf32>
    %79 = vector.extract_strided_slice %70 {offsets = [0, 1], sizes = [16, 256], strides = [1, 1]} : vector<16x290xf32> to vector<16x256xf32>
    %c1_44 = arith.constant 1 : index
    %c0_45 = arith.constant 0 : index
    %c0_46 = arith.constant 0 : index
    %80 = vector.load %arg5[%c1_44, %c0_45, %c0_46] : memref<9x16x16xf32, #tpu.memory_space<vmem>>, vector<1x16x16xf32>
    %81 = vector.shape_cast %80 : vector<1x16x16xf32> to vector<16x16xf32>
    %cst_47 = arith.constant dense<0.000000e+00> : vector<16x256xf32>
    %82 = tpu.matmul %81, %79, %cst_47 {dimension_numbers = #tpu.dot_dimension_numbers<[1], [0], [0], [1], [0, 0, 1, 1], [], []>} : vector<16x16xf32>, vector<16x256xf32>, vector<16x256xf32> -> vector<16x256xf32>
    %83 = arith.addf %78, %82 : vector<16x256xf32>
    %84 = vector.extract_strided_slice %70 {offsets = [0, 2], sizes = [16, 256], strides = [1, 1]} : vector<16x290xf32> to vector<16x256xf32>
    %85 = vector.broadcast %1 : vector<1x256xf32> to vector<16x256xf32>
    %86 = arith.mulf %84, %85 : vector<16x256xf32>
    %c2_48 = arith.constant 2 : index
    %c0_49 = arith.constant 0 : index
    %c0_50 = arith.constant 0 : index
    %87 = vector.load %arg5[%c2_48, %c0_49, %c0_50] : memref<9x16x16xf32, #tpu.memory_space<vmem>>, vector<1x16x16xf32>
    %88 = vector.shape_cast %87 : vector<1x16x16xf32> to vector<16x16xf32>
    %cst_51 = arith.constant dense<0.000000e+00> : vector<16x256xf32>
    %89 = tpu.matmul %88, %86, %cst_51 {dimension_numbers = #tpu.dot_dimension_numbers<[1], [0], [0], [1], [0, 0, 1, 1], [], []>} : vector<16x16xf32>, vector<16x256xf32>, vector<16x256xf32> -> vector<16x256xf32>
    %90 = arith.addf %83, %89 : vector<16x256xf32>
    %91 = vector.extract_strided_slice %70 {offsets = [0, 16], sizes = [16, 256], strides = [1, 1]} : vector<16x290xf32> to vector<16x256xf32>
    %92 = vector.broadcast %0 : vector<1x256xf32> to vector<16x256xf32>
    %93 = arith.mulf %91, %92 : vector<16x256xf32>
    %c3_52 = arith.constant 3 : index
    %c0_53 = arith.constant 0 : index
    %c0_54 = arith.constant 0 : index
    %94 = vector.load %arg5[%c3_52, %c0_53, %c0_54] : memref<9x16x16xf32, #tpu.memory_space<vmem>>, vector<1x16x16xf32>
    %95 = vector.shape_cast %94 : vector<1x16x16xf32> to vector<16x16xf32>
    %cst_55 = arith.constant dense<0.000000e+00> : vector<16x256xf32>
    %96 = tpu.matmul %95, %93, %cst_55 {dimension_numbers = #tpu.dot_dimension_numbers<[1], [0], [0], [1], [0, 0, 1, 1], [], []>} : vector<16x16xf32>, vector<16x256xf32>, vector<16x256xf32> -> vector<16x256xf32>
    %97 = arith.addf %90, %96 : vector<16x256xf32>
    %98 = vector.extract_strided_slice %70 {offsets = [0, 17], sizes = [16, 256], strides = [1, 1]} : vector<16x290xf32> to vector<16x256xf32>
    %c4_56 = arith.constant 4 : index
    %c0_57 = arith.constant 0 : index
    %c0_58 = arith.constant 0 : index
    %99 = vector.load %arg5[%c4_56, %c0_57, %c0_58] : memref<9x16x16xf32, #tpu.memory_space<vmem>>, vector<1x16x16xf32>
    %100 = vector.shape_cast %99 : vector<1x16x16xf32> to vector<16x16xf32>
    %cst_59 = arith.constant dense<0.000000e+00> : vector<16x256xf32>
    %101 = tpu.matmul %100, %98, %cst_59 {dimension_numbers = #tpu.dot_dimension_numbers<[1], [0], [0], [1], [0, 0, 1, 1], [], []>} : vector<16x16xf32>, vector<16x256xf32>, vector<16x256xf32> -> vector<16x256xf32>
    %102 = arith.addf %97, %101 : vector<16x256xf32>
    %103 = vector.extract_strided_slice %70 {offsets = [0, 18], sizes = [16, 256], strides = [1, 1]} : vector<16x290xf32> to vector<16x256xf32>
    %104 = vector.broadcast %1 : vector<1x256xf32> to vector<16x256xf32>
    %105 = arith.mulf %103, %104 : vector<16x256xf32>
    %c5_60 = arith.constant 5 : index
    %c0_61 = arith.constant 0 : index
    %c0_62 = arith.constant 0 : index
    %106 = vector.load %arg5[%c5_60, %c0_61, %c0_62] : memref<9x16x16xf32, #tpu.memory_space<vmem>>, vector<1x16x16xf32>
    %107 = vector.shape_cast %106 : vector<1x16x16xf32> to vector<16x16xf32>
    %cst_63 = arith.constant dense<0.000000e+00> : vector<16x256xf32>
    %108 = tpu.matmul %107, %105, %cst_63 {dimension_numbers = #tpu.dot_dimension_numbers<[1], [0], [0], [1], [0, 0, 1, 1], [], []>} : vector<16x16xf32>, vector<16x256xf32>, vector<16x256xf32> -> vector<16x256xf32>
    %109 = arith.addf %102, %108 : vector<16x256xf32>
    %110 = vector.extract_strided_slice %70 {offsets = [0, 32], sizes = [16, 256], strides = [1, 1]} : vector<16x290xf32> to vector<16x256xf32>
    %111 = vector.broadcast %0 : vector<1x256xf32> to vector<16x256xf32>
    %112 = arith.mulf %110, %111 : vector<16x256xf32>
    %c6_64 = arith.constant 6 : index
    %c0_65 = arith.constant 0 : index
    %c0_66 = arith.constant 0 : index
    %113 = vector.load %arg5[%c6_64, %c0_65, %c0_66] : memref<9x16x16xf32, #tpu.memory_space<vmem>>, vector<1x16x16xf32>
    %114 = vector.shape_cast %113 : vector<1x16x16xf32> to vector<16x16xf32>
    %cst_67 = arith.constant dense<0.000000e+00> : vector<16x256xf32>
    %115 = tpu.matmul %114, %112, %cst_67 {dimension_numbers = #tpu.dot_dimension_numbers<[1], [0], [0], [1], [0, 0, 1, 1], [], []>} : vector<16x16xf32>, vector<16x256xf32>, vector<16x256xf32> -> vector<16x256xf32>
    %116 = arith.addf %109, %115 : vector<16x256xf32>
    %117 = vector.extract_strided_slice %70 {offsets = [0, 33], sizes = [16, 256], strides = [1, 1]} : vector<16x290xf32> to vector<16x256xf32>
    %c7_68 = arith.constant 7 : index
    %c0_69 = arith.constant 0 : index
    %c0_70 = arith.constant 0 : index
    %118 = vector.load %arg5[%c7_68, %c0_69, %c0_70] : memref<9x16x16xf32, #tpu.memory_space<vmem>>, vector<1x16x16xf32>
    %119 = vector.shape_cast %118 : vector<1x16x16xf32> to vector<16x16xf32>
    %cst_71 = arith.constant dense<0.000000e+00> : vector<16x256xf32>
    %120 = tpu.matmul %119, %117, %cst_71 {dimension_numbers = #tpu.dot_dimension_numbers<[1], [0], [0], [1], [0, 0, 1, 1], [], []>} : vector<16x16xf32>, vector<16x256xf32>, vector<16x256xf32> -> vector<16x256xf32>
    %121 = arith.addf %116, %120 : vector<16x256xf32>
    %122 = vector.extract_strided_slice %70 {offsets = [0, 34], sizes = [16, 256], strides = [1, 1]} : vector<16x290xf32> to vector<16x256xf32>
    %123 = vector.broadcast %1 : vector<1x256xf32> to vector<16x256xf32>
    %124 = arith.mulf %122, %123 : vector<16x256xf32>
    %c8_72 = arith.constant 8 : index
    %c0_73 = arith.constant 0 : index
    %c0_74 = arith.constant 0 : index
    %125 = vector.load %arg5[%c8_72, %c0_73, %c0_74] : memref<9x16x16xf32, #tpu.memory_space<vmem>>, vector<1x16x16xf32>
    %126 = vector.shape_cast %125 : vector<1x16x16xf32> to vector<16x16xf32>
    %cst_75 = arith.constant dense<0.000000e+00> : vector<16x256xf32>
    %127 = tpu.matmul %126, %124, %cst_75 {dimension_numbers = #tpu.dot_dimension_numbers<[1], [0], [0], [1], [0, 0, 1, 1], [], []>} : vector<16x16xf32>, vector<16x256xf32>, vector<16x256xf32> -> vector<16x256xf32>
    %128 = arith.addf %121, %127 : vector<16x256xf32>
    %c0_76 = arith.constant 0 : index
    %c0_77 = arith.constant 0 : index
    %129 = vector.load %arg6[%c0_76, %c0_77] : memref<16x1xf32, #tpu.memory_space<vmem>>, vector<16x1xf32>
    %130 = vector.broadcast %129 : vector<16x1xf32> to vector<16x256xf32>
    %131 = arith.addf %128, %130 : vector<16x256xf32>
    %cst_78 = arith.constant 0.000000e+00 : f32
    %132 = vector.broadcast %cst_78 : f32 to vector<16x256xf32>
    %133 = arith.maximumf %131, %132 : vector<16x256xf32>
    %cst_79 = arith.constant 0.000000e+00 : f32
    %134 = vector.broadcast %cst_79 : f32 to vector<16x17xf32>
    %135 = tpu.concatenate %134, %133, %134 in 1 : vector<16x17xf32>, vector<16x256xf32>, vector<16x17xf32> -> vector<16x290xf32>
    %cst_80 = arith.constant 0.000000e+00 : f32
    %136 = vector.broadcast %cst_80 : f32 to vector<16x256xf32>
    %137 = vector.extract_strided_slice %135 {offsets = [0, 0], sizes = [16, 256], strides = [1, 1]} : vector<16x290xf32> to vector<16x256xf32>
    %138 = vector.broadcast %0 : vector<1x256xf32> to vector<16x256xf32>
    %139 = arith.mulf %137, %138 : vector<16x256xf32>
    %c0_81 = arith.constant 0 : index
    %c0_82 = arith.constant 0 : index
    %c0_83 = arith.constant 0 : index
    %140 = vector.load %arg7[%c0_81, %c0_82, %c0_83] : memref<9x16x16xf32, #tpu.memory_space<vmem>>, vector<1x16x16xf32>
    %141 = vector.shape_cast %140 : vector<1x16x16xf32> to vector<16x16xf32>
    %cst_84 = arith.constant dense<0.000000e+00> : vector<16x256xf32>
    %142 = tpu.matmul %141, %139, %cst_84 {dimension_numbers = #tpu.dot_dimension_numbers<[1], [0], [0], [1], [0, 0, 1, 1], [], []>} : vector<16x16xf32>, vector<16x256xf32>, vector<16x256xf32> -> vector<16x256xf32>
    %143 = arith.addf %136, %142 : vector<16x256xf32>
    %144 = vector.extract_strided_slice %135 {offsets = [0, 1], sizes = [16, 256], strides = [1, 1]} : vector<16x290xf32> to vector<16x256xf32>
    %c1_85 = arith.constant 1 : index
    %c0_86 = arith.constant 0 : index
    %c0_87 = arith.constant 0 : index
    %145 = vector.load %arg7[%c1_85, %c0_86, %c0_87] : memref<9x16x16xf32, #tpu.memory_space<vmem>>, vector<1x16x16xf32>
    %146 = vector.shape_cast %145 : vector<1x16x16xf32> to vector<16x16xf32>
    %cst_88 = arith.constant dense<0.000000e+00> : vector<16x256xf32>
    %147 = tpu.matmul %146, %144, %cst_88 {dimension_numbers = #tpu.dot_dimension_numbers<[1], [0], [0], [1], [0, 0, 1, 1], [], []>} : vector<16x16xf32>, vector<16x256xf32>, vector<16x256xf32> -> vector<16x256xf32>
    %148 = arith.addf %143, %147 : vector<16x256xf32>
    %149 = vector.extract_strided_slice %135 {offsets = [0, 2], sizes = [16, 256], strides = [1, 1]} : vector<16x290xf32> to vector<16x256xf32>
    %150 = vector.broadcast %1 : vector<1x256xf32> to vector<16x256xf32>
    %151 = arith.mulf %149, %150 : vector<16x256xf32>
    %c2_89 = arith.constant 2 : index
    %c0_90 = arith.constant 0 : index
    %c0_91 = arith.constant 0 : index
    %152 = vector.load %arg7[%c2_89, %c0_90, %c0_91] : memref<9x16x16xf32, #tpu.memory_space<vmem>>, vector<1x16x16xf32>
    %153 = vector.shape_cast %152 : vector<1x16x16xf32> to vector<16x16xf32>
    %cst_92 = arith.constant dense<0.000000e+00> : vector<16x256xf32>
    %154 = tpu.matmul %153, %151, %cst_92 {dimension_numbers = #tpu.dot_dimension_numbers<[1], [0], [0], [1], [0, 0, 1, 1], [], []>} : vector<16x16xf32>, vector<16x256xf32>, vector<16x256xf32> -> vector<16x256xf32>
    %155 = arith.addf %148, %154 : vector<16x256xf32>
    %156 = vector.extract_strided_slice %135 {offsets = [0, 16], sizes = [16, 256], strides = [1, 1]} : vector<16x290xf32> to vector<16x256xf32>
    %157 = vector.broadcast %0 : vector<1x256xf32> to vector<16x256xf32>
    %158 = arith.mulf %156, %157 : vector<16x256xf32>
    %c3_93 = arith.constant 3 : index
    %c0_94 = arith.constant 0 : index
    %c0_95 = arith.constant 0 : index
    %159 = vector.load %arg7[%c3_93, %c0_94, %c0_95] : memref<9x16x16xf32, #tpu.memory_space<vmem>>, vector<1x16x16xf32>
    %160 = vector.shape_cast %159 : vector<1x16x16xf32> to vector<16x16xf32>
    %cst_96 = arith.constant dense<0.000000e+00> : vector<16x256xf32>
    %161 = tpu.matmul %160, %158, %cst_96 {dimension_numbers = #tpu.dot_dimension_numbers<[1], [0], [0], [1], [0, 0, 1, 1], [], []>} : vector<16x16xf32>, vector<16x256xf32>, vector<16x256xf32> -> vector<16x256xf32>
    %162 = arith.addf %155, %161 : vector<16x256xf32>
    %163 = vector.extract_strided_slice %135 {offsets = [0, 17], sizes = [16, 256], strides = [1, 1]} : vector<16x290xf32> to vector<16x256xf32>
    %c4_97 = arith.constant 4 : index
    %c0_98 = arith.constant 0 : index
    %c0_99 = arith.constant 0 : index
    %164 = vector.load %arg7[%c4_97, %c0_98, %c0_99] : memref<9x16x16xf32, #tpu.memory_space<vmem>>, vector<1x16x16xf32>
    %165 = vector.shape_cast %164 : vector<1x16x16xf32> to vector<16x16xf32>
    %cst_100 = arith.constant dense<0.000000e+00> : vector<16x256xf32>
    %166 = tpu.matmul %165, %163, %cst_100 {dimension_numbers = #tpu.dot_dimension_numbers<[1], [0], [0], [1], [0, 0, 1, 1], [], []>} : vector<16x16xf32>, vector<16x256xf32>, vector<16x256xf32> -> vector<16x256xf32>
    %167 = arith.addf %162, %166 : vector<16x256xf32>
    %168 = vector.extract_strided_slice %135 {offsets = [0, 18], sizes = [16, 256], strides = [1, 1]} : vector<16x290xf32> to vector<16x256xf32>
    %169 = vector.broadcast %1 : vector<1x256xf32> to vector<16x256xf32>
    %170 = arith.mulf %168, %169 : vector<16x256xf32>
    %c5_101 = arith.constant 5 : index
    %c0_102 = arith.constant 0 : index
    %c0_103 = arith.constant 0 : index
    %171 = vector.load %arg7[%c5_101, %c0_102, %c0_103] : memref<9x16x16xf32, #tpu.memory_space<vmem>>, vector<1x16x16xf32>
    %172 = vector.shape_cast %171 : vector<1x16x16xf32> to vector<16x16xf32>
    %cst_104 = arith.constant dense<0.000000e+00> : vector<16x256xf32>
    %173 = tpu.matmul %172, %170, %cst_104 {dimension_numbers = #tpu.dot_dimension_numbers<[1], [0], [0], [1], [0, 0, 1, 1], [], []>} : vector<16x16xf32>, vector<16x256xf32>, vector<16x256xf32> -> vector<16x256xf32>
    %174 = arith.addf %167, %173 : vector<16x256xf32>
    %175 = vector.extract_strided_slice %135 {offsets = [0, 32], sizes = [16, 256], strides = [1, 1]} : vector<16x290xf32> to vector<16x256xf32>
    %176 = vector.broadcast %0 : vector<1x256xf32> to vector<16x256xf32>
    %177 = arith.mulf %175, %176 : vector<16x256xf32>
    %c6_105 = arith.constant 6 : index
    %c0_106 = arith.constant 0 : index
    %c0_107 = arith.constant 0 : index
    %178 = vector.load %arg7[%c6_105, %c0_106, %c0_107] : memref<9x16x16xf32, #tpu.memory_space<vmem>>, vector<1x16x16xf32>
    %179 = vector.shape_cast %178 : vector<1x16x16xf32> to vector<16x16xf32>
    %cst_108 = arith.constant dense<0.000000e+00> : vector<16x256xf32>
    %180 = tpu.matmul %179, %177, %cst_108 {dimension_numbers = #tpu.dot_dimension_numbers<[1], [0], [0], [1], [0, 0, 1, 1], [], []>} : vector<16x16xf32>, vector<16x256xf32>, vector<16x256xf32> -> vector<16x256xf32>
    %181 = arith.addf %174, %180 : vector<16x256xf32>
    %182 = vector.extract_strided_slice %135 {offsets = [0, 33], sizes = [16, 256], strides = [1, 1]} : vector<16x290xf32> to vector<16x256xf32>
    %c7_109 = arith.constant 7 : index
    %c0_110 = arith.constant 0 : index
    %c0_111 = arith.constant 0 : index
    %183 = vector.load %arg7[%c7_109, %c0_110, %c0_111] : memref<9x16x16xf32, #tpu.memory_space<vmem>>, vector<1x16x16xf32>
    %184 = vector.shape_cast %183 : vector<1x16x16xf32> to vector<16x16xf32>
    %cst_112 = arith.constant dense<0.000000e+00> : vector<16x256xf32>
    %185 = tpu.matmul %184, %182, %cst_112 {dimension_numbers = #tpu.dot_dimension_numbers<[1], [0], [0], [1], [0, 0, 1, 1], [], []>} : vector<16x16xf32>, vector<16x256xf32>, vector<16x256xf32> -> vector<16x256xf32>
    %186 = arith.addf %181, %185 : vector<16x256xf32>
    %187 = vector.extract_strided_slice %135 {offsets = [0, 34], sizes = [16, 256], strides = [1, 1]} : vector<16x290xf32> to vector<16x256xf32>
    %188 = vector.broadcast %1 : vector<1x256xf32> to vector<16x256xf32>
    %189 = arith.mulf %187, %188 : vector<16x256xf32>
    %c8_113 = arith.constant 8 : index
    %c0_114 = arith.constant 0 : index
    %c0_115 = arith.constant 0 : index
    %190 = vector.load %arg7[%c8_113, %c0_114, %c0_115] : memref<9x16x16xf32, #tpu.memory_space<vmem>>, vector<1x16x16xf32>
    %191 = vector.shape_cast %190 : vector<1x16x16xf32> to vector<16x16xf32>
    %cst_116 = arith.constant dense<0.000000e+00> : vector<16x256xf32>
    %192 = tpu.matmul %191, %189, %cst_116 {dimension_numbers = #tpu.dot_dimension_numbers<[1], [0], [0], [1], [0, 0, 1, 1], [], []>} : vector<16x16xf32>, vector<16x256xf32>, vector<16x256xf32> -> vector<16x256xf32>
    %193 = arith.addf %186, %192 : vector<16x256xf32>
    %c0_117 = arith.constant 0 : index
    %c0_118 = arith.constant 0 : index
    %194 = vector.load %arg8[%c0_117, %c0_118] : memref<16x1xf32, #tpu.memory_space<vmem>>, vector<16x1xf32>
    %195 = vector.broadcast %194 : vector<16x1xf32> to vector<16x256xf32>
    %196 = arith.addf %193, %195 : vector<16x256xf32>
    %cst_119 = arith.constant 0.000000e+00 : f32
    %197 = vector.broadcast %cst_119 : f32 to vector<16x256xf32>
    %198 = arith.maximumf %196, %197 : vector<16x256xf32>
    %199 = vector.extract_strided_slice %198 {offsets = [0, 0], sizes = [1, 256], strides = [1, 1]} : vector<16x256xf32> to vector<1x256xf32>
    %c0_120 = arith.constant 0 : index
    %c0_121 = arith.constant 0 : index
    %200 = vector.load %arg9[%c0_120, %c0_121] : memref<256x16xf32, #tpu.memory_space<vmem>>, vector<256x16xf32>
    %cst_122 = arith.constant dense<0.000000e+00> : vector<1x16xf32>
    %201 = tpu.matmul %199, %200, %cst_122 {dimension_numbers = #tpu.dot_dimension_numbers<[1], [0], [0], [1], [0, 0, 1, 1], [], []>} : vector<1x256xf32>, vector<256x16xf32>, vector<1x16xf32> -> vector<1x16xf32>
    %c0_123 = arith.constant 0 : index
    %c0_124 = arith.constant 0 : index
    %202 = vector.load %arg10[%c0_123, %c0_124] : memref<16x30xf32, #tpu.memory_space<vmem>>, vector<16x30xf32>
    %cst_125 = arith.constant dense<0.000000e+00> : vector<1x30xf32>
    %203 = tpu.matmul %201, %202, %cst_125 {dimension_numbers = #tpu.dot_dimension_numbers<[1], [0], [0], [1], [0, 0, 1, 1], [], []>} : vector<1x16xf32>, vector<16x30xf32>, vector<1x30xf32> -> vector<1x30xf32>
    %c0_126 = arith.constant 0 : index
    %c0_127 = arith.constant 0 : index
    %204 = vector.load %arg11[%c0_126, %c0_127] : memref<1x30xf32, #tpu.memory_space<vmem>>, vector<1x30xf32>
    %205 = arith.addf %203, %204 : vector<1x30xf32>
    %cst_128 = arith.constant 0.000000e+00 : f32
    %206 = vector.broadcast %cst_128 : f32 to vector<1x30xf32>
    %207 = arith.maximumf %205, %206 : vector<1x30xf32>
    %c0_129 = arith.constant 0 : index
    %c0_130 = arith.constant 0 : index
    %208 = vector.load %arg12[%c0_129, %c0_130] : memref<1x30xf32, #tpu.memory_space<vmem>>, vector<1x30xf32>
    %209 = arith.mulf %207, %208 : vector<1x30xf32>
    %cst_131 = arith.constant dense<0.000000e+00> : vector<1xf32>
    %210 = vector.multi_reduction <add>, %209, %cst_131 [1] : vector<1x30xf32> to vector<1xf32>
    %211 = vector.shape_cast %210 : vector<1xf32> to vector<1x1xf32>
    %c0_132 = arith.constant 0 : index
    %c0_133 = arith.constant 0 : index
    %212 = vector.load %arg13[%c0_132, %c0_133] : memref<1x1xf32, #tpu.memory_space<vmem>>, vector<1x1xf32>
    %213 = arith.addf %211, %212 : vector<1x1xf32>
    %214 = vector.shape_cast %213 : vector<1x1xf32> to vector<1x1x1xf32>
    %c0_134 = arith.constant 0 : index
    %c0_135 = arith.constant 0 : index
    %c0_136 = arith.constant 0 : index
    %215 = vector.load %arg14[%c0_134, %c0_135, %c0_136] : memref<1x1x1xf32, #tpu.memory_space<vmem>>, vector<1x1x1xf32>
    tpu.vector_store %arg14[%c0_134, %c0_135, %c0_136], %214 {strides = array<i32>} : memref<1x1x1xf32, #tpu.memory_space<vmem>>, vector<1x1x1xf32>,
    return
  }
  func.func @transform_0(%arg0: i32) -> (i32, i32, i32) {
    %c0_i32 = arith.constant 0 : i32
    %c0_i32_0 = arith.constant 0 : i32
    %c0_i32_1 = arith.constant 0 : i32
    return %arg0, %c0_i32, %c0_i32_0 : i32, i32, i32
  }
  func.func @transform_1(%arg0: i32) -> (i32, i32) {
    %c0_i32 = arith.constant 0 : i32
    %c0_i32_0 = arith.constant 0 : i32
    %c0_i32_1 = arith.constant 0 : i32
    return %c0_i32, %c0_i32_0 : i32, i32
  }
  func.func @transform_2(%arg0: i32) -> (i32, i32, i32) {
    %c0_i32 = arith.constant 0 : i32
    %c0_i32_0 = arith.constant 0 : i32
    %c0_i32_1 = arith.constant 0 : i32
    %c0_i32_2 = arith.constant 0 : i32
    return %c0_i32, %c0_i32_0, %c0_i32_1 : i32, i32, i32
  }
  func.func @transform_3(%arg0: i32) -> (i32, i32) {
    %c0_i32 = arith.constant 0 : i32
    %c0_i32_0 = arith.constant 0 : i32
    %c0_i32_1 = arith.constant 0 : i32
    return %c0_i32, %c0_i32_0 : i32, i32
  }
  func.func @transform_4(%arg0: i32) -> (i32, i32, i32) {
    %c0_i32 = arith.constant 0 : i32
    %c0_i32_0 = arith.constant 0 : i32
    %c0_i32_1 = arith.constant 0 : i32
    %c0_i32_2 = arith.constant 0 : i32
    return %c0_i32, %c0_i32_0, %c0_i32_1 : i32, i32, i32
  }
  func.func @transform_5(%arg0: i32) -> (i32, i32) {
    %c0_i32 = arith.constant 0 : i32
    %c0_i32_0 = arith.constant 0 : i32
    %c0_i32_1 = arith.constant 0 : i32
    return %c0_i32, %c0_i32_0 : i32, i32
  }
  func.func @transform_6(%arg0: i32) -> (i32, i32, i32) {
    %c0_i32 = arith.constant 0 : i32
    %c0_i32_0 = arith.constant 0 : i32
    %c0_i32_1 = arith.constant 0 : i32
    %c0_i32_2 = arith.constant 0 : i32
    return %c0_i32, %c0_i32_0, %c0_i32_1 : i32, i32, i32
  }
  func.func @transform_7(%arg0: i32) -> (i32, i32) {
    %c0_i32 = arith.constant 0 : i32
    %c0_i32_0 = arith.constant 0 : i32
    %c0_i32_1 = arith.constant 0 : i32
    return %c0_i32, %c0_i32_0 : i32, i32
  }
  func.func @transform_8(%arg0: i32) -> (i32, i32) {
    %c0_i32 = arith.constant 0 : i32
    %c0_i32_0 = arith.constant 0 : i32
    %c0_i32_1 = arith.constant 0 : i32
    return %c0_i32, %c0_i32_0 : i32, i32
  }
  func.func @transform_9(%arg0: i32) -> (i32, i32) {
    %c0_i32 = arith.constant 0 : i32
    %c0_i32_0 = arith.constant 0 : i32
    %c0_i32_1 = arith.constant 0 : i32
    return %c0_i32, %c0_i32_0 : i32, i32
  }
  func.func @transform_10(%arg0: i32) -> (i32, i32) {
    %c0_i32 = arith.constant 0 : i32
    %c0_i32_0 = arith.constant 0 : i32
    %c0_i32_1 = arith.constant 0 : i32
    return %c0_i32, %c0_i32_0 : i32, i32
  }
  func.func @transform_11(%arg0: i32) -> (i32, i32) {
    %c0_i32 = arith.constant 0 : i32
    %c0_i32_0 = arith.constant 0 : i32
    %c0_i32_1 = arith.constant 0 : i32
    return %c0_i32, %c0_i32_0 : i32, i32
  }
  func.func @transform_12(%arg0: i32) -> (i32, i32) {
    %c0_i32 = arith.constant 0 : i32
    %c0_i32_0 = arith.constant 0 : i32
    %c0_i32_1 = arith.constant 0 : i32
    return %c0_i32, %c0_i32_0 : i32, i32
  }
  func.func @transform_13(%arg0: i32) -> (i32, i32, i32) {
    %c0_i32 = arith.constant 0 : i32
    %c0_i32_0 = arith.constant 0 : i32
    %c0_i32_1 = arith.constant 0 : i32
    return %arg0, %c0_i32, %c0_i32_0 : i32, i32, i32
  }
}

</mosaic_0001>

<bundles_post_ra>
// kernel: net_forward.1
= control target key start
LH: loop header
LB: loop body
LE: loop exit
PB: predicated region body
PF: predicated region fallthrough
CT: control target
= control target key end

     0   :  { %s4521_s27 = smov 0   ;;  %s5464_s0 = inlined_call_operand.vmem [shape: f32[2,8,256], index: 0, kind: input, shape index: {}]   ;;  %s5465_s1 = inlined_call_operand.vmem [shape: f32[2,256], index: 1, kind: input, shape index: {}]   ;;  %s5466_s2 = inlined_call_operand.vmem [shape: f32[9,16,8], index: 2, kind: input, shape index: {}]   ;;  %s5467_s3 = inlined_call_operand.vmem [shape: f32[16,1], index: 3, kind: input, shape index: {}]   ;;  %s5468_s4 = inlined_call_operand.vmem [shape: f32[9,16,16], index: 4, kind: input, shape index: {}]   ;;  %s5469_s5 = inlined_call_operand.vmem [shape: f32[16,1], index: 5, kind: input, shape index: {}]   ;;  %s5470_s6 = inlined_call_operand.vmem [shape: f32[9,16,16], index: 6, kind: input, shape index: {}]   ;;  %s5471_s7 = inlined_call_operand.vmem [shape: f32[16,1], index: 7, kind: input, shape index: {}]   ;;  %s5472_s8 = inlined_call_operand.vmem [shape: f32[256,16], index: 8, kind: input, shape index: {}]   ;;  %s5473_s9 = inlined_call_operand.vmem [shape: f32[16,30], index: 9, kind: input, shape index: {}]   ;;  %s5474_s10 = inlined_call_operand.vmem [shape: f32[1,30], index: 10, kind: input, shape index: {}]   ;;  %s5475_s11 = inlined_call_operand.vmem [shape: f32[1,30], index: 11, kind: input, shape index: {}]   ;;  %s5476_s12 = inlined_call_operand.<no memory space> [shape: f32[1,1], index: 12, kind: input, shape index: {}]   ;;  %s5477_s13 = inlined_call_operand.vmem [shape: f32[2,1,1], index: 13, kind: output, shape index: {}]  }
   0x1   :  { %v18_v0 = vstv %s5476_s12 }
   0x2   :  { %19 = vst [vmem:[#allocation2] sm:$0x1] %v18_v0 }
   0x3 LB: > { %s3806_s28 = sadd.s32 4294967295, %s4428_s27   ;;  %p3810_p0 = scmp.ge.s32.totalorder %s4428_s27, 1  ;;  %s4428_s27 = sphi %s4521_s27, %s25_s27  }
   0x4   : > { %p389_p1 = scmp.lt.s32.totalorder %s4428_s27, 3 }
   0x6   : > { %p390_p2 = pnand %p3810_p0, %p389_p1 }
   0x7   : > { %p431_p3 = scmp.lt.s32.totalorder (!%p390_p2), %s3806_s28, 1  ;;  %v458_v1 = vlaneseq (!%p390_p2)  ;;  %v3813_v3 = vld [vmem:[%s5465_s1 + $0x1] ss:$2 sm:$0x3] (!%p390_p2)  ;;  %s4430_s17 = smov (!%p390_p2), 17   ;;  %v4436_v15 = vmov (!%p390_p2), 0.0  }
   0x8   : > { %393 = sbr.rel (%p390_p2) target bundleno = 2164 (0x874), region = 72  ;;  %s4431_s18 = smov (!%p390_p2), 2   ;;  %v439_v8 = vld [vmem:[%s5465_s1] ss:$2 sm:$0x3] (!%p390_p2)  ;;  %763 = vmatprep.mubr.f32.mxu0 (!%p390_p2), %v4436_v15  ;;  %559 = vmatprep.mubr.f32.mxu1 (!%p390_p2), %v4436_v15  ;;  %vm668_vm0 = vcmask (!%p390_p2), 15360  }
   0x9   : > { %v459_v2 = vshrl.u32 (!%p390_p2), %v458_v1, 7  ;;  %s4432_s21 = smov (!%p390_p2), 16   ;;  %s4433_s22 = smov (!%p390_p2), 18   ;;  %vm450_vm1 = vcmask (!%p390_p2), 138240   ;;  %vm784_vm2 = vcmask (!%p390_p2), 130048   ;;  %vm1001_vm3 = vcmask (!%p390_p2), 146432  }
   0xa   : > { %s4434_s23 = smov (!%p390_p2), 32   ;;  %s4435_s24 = smov (!%p390_p2), 34   ;;  %vm1117_vm4 = vcmask (!%p390_p2), 261120   ;;  %vm1334_vm5 = vcmask (!%p390_p2), 277504   ;;  %v1446_v49 = vld [vmem:[%s5467_s3] sm:$0xff] (!%p390_p2)  ;;  %v1447_v50 = vld [vmem:[%s5467_s3 + $0x8] sm:$0xff] (!%p390_p2) }
   0xb   : > { %v460_v4 = vsub.s32 (!%p390_p2), 0, %v459_v2  ;;  %v464_v5 = vsub.s32 (!%p390_p2), 1, %v459_v2  ;;  %s4437_s25 = smov (!%p390_p2), 126   ;;  %s4438_s26 = smov (!%p390_p2), 112   ;;  %v4445_v51 = vmov (!%p390_p2), 0   ;;  %vm688_vm6 = vcmask (!%p390_p2), 1031168  }
   0xc   : > { %s4439_s12 = smov (!%p390_p2), 111   ;;  %s4440_s29 = smov (!%p390_p2), 110   ;;  %4180 = vset.pattern.permute.xlu0 (!%p390_p2), %v4445_v51  ;;  %4181 = vset.pattern.permute.xlu1 (!%p390_p2), %v4445_v51  ;;  %vm488_vm7 = vcmask (!%p390_p2), 64512   ;;  %v3820_v57 = vld [vmem:[%s5466_s2 + $0x20] sm:$0xff] (!%p390_p2)  ;;  %vm804_vm8 = vcmask (!%p390_p2), 916480   ;;  %vm905_vm9 = vcmask (!%p390_p2), 908288  }
   0xd   : > { %v659_v7 = vrot.slane (!%p390_p2), %v3813_v3, %v460_v4  ;;  %v663_v10 = vrot.slane (!%p390_p2), %v3813_v3, %v464_v5  ;;  %v4542_v11 = vrot.slane (!%p390_p2), %v439_v8, %v460_v4  ;;  %v4545_v12 = vrot.slane (!%p390_p2), %v439_v8, %v464_v5  ;;  %s4442_s14 = smov (!%p390_p2), 96   ;;  %s4443_s15 = smov (!%p390_p2), 95   ;;  %v3824_v1 = vld [vmem:[%s5466_s2 + $0x30] sm:$0xff] (!%p390_p2)  ;;  %v3825_v5 = vld [vmem:[%s5466_s2 + $0x38] sm:$0xff] (!%p390_p2) }
   0xe   : > { %vm1021_vm10 = vcmask (!%p390_p2), 900096   ;;  %vm483_vm11 = vcmask (!%p390_p2), 1039360   ;;  %vm1137_vm12 = vcmask (!%p390_p2), 785408   ;;  %vm1238_vm13 = vcmask (!%p390_p2), 777216  }
   0xf   : > { %s5479_s28 = smov (!%p431_p3, %s3806_s28), 1  ;;  %664 = vrot.lane.b32.xlu1 %v659_v7, %s4431_s18  ;;  %vm1354_vm14 = vcmask 769024   ;;  %vm4447_vm15 = vmmov 0  }
  0x10   : > { %s3919_s30 = sshll.u32 %s5479_s28, 4 }
  0x11   : > { %s435_s16 = scalar_lea.vmem %s5464_s0, %s3919_s30  ;;  %s4441_s30 = smov 127  }
  0x12   : > { %v442_v6 = vld [vmem:[%s435_s16] sm:$0xff]  ;;  %v443_v9 = vld [vmem:[%s435_s16 + $0x8] sm:$0xff]  ;;  %s4444_s16 = smov 94  }
  0x13   : > { %446 = vrot.lane.b32.xlu0 %v442_v6, %s4430_s17  ;;  %666 = vrot.lane.b32.xlu1 %v663_v10, %s4431_s18 }
  0x17   : > { %448 = vrot.lane.b32.xlu0 %v443_v9, %s4430_s17  ;;  %782 = vrot.lane.b32.xlu1 %v4545_v12, %s4432_s21  ;;  %v3828_v9 = vld [vmem:[%s5466_s2 + $0x40] sm:$0xff] }
  0x1b   : > { %780 = vrot.lane.b32.xlu0 %v4542_v11, %s4432_s21  ;;  %999 = vrot.lane.b32.xlu1 %v663_v10, %s4433_s22 }
  0x1f   : > { %997 = vrot.lane.b32.xlu0 %v659_v7, %s4433_s22  ;;  %1115 = vrot.lane.b32.xlu1 %v4545_v12, %s4434_s23 }
  0x23   : > { %1113 = vrot.lane.b32.xlu0 %v4542_v11, %s4434_s23  ;;  %1332 = vrot.lane.b32.xlu1 %v663_v10, %s4435_s24 }
  0x27   : > { %1330 = vrot.lane.b32.xlu0 %v659_v7, %s4435_s24 }
  0x81   : > { %v4551_v14 = vpop.permute.xlu1 %664 }
  0x85   : > { %v447_v13 = vpop.permute.xlu0 %446  ;;  %v4561_v19 = vpop.permute.xlu1 %666 }
  0x86   : > { %v4567_v21 = vsel %vm668_vm0, %v4551_v14, %v4561_v19  ;;  %v4572_v23 = vsel %vm450_vm1, 0.0, %v447_v13  ;;  %vm3751_vm0 = vcmask 237568  }
  0x87   : > { %v673_v27 = vmul.f32 %v4551_v14, %v4572_v23 }
  0x89   : > { %v449_v16 = vpop.permute.xlu0 %448  ;;  %v4577_v25 = vpop.permute.xlu1 %782 }
  0x8a   : > { %v4556_v17 = vsel %vm450_vm1, %v447_v13, %v449_v16  ;;  %v4559_v18 = vsel %vm450_vm1, %v449_v16, 0.0 }
  0x8b   : > { %v675_v20 = vmul.f32 %v4561_v19, %v4559_v18  ;;  %v674_v22 = vmul.f32 %v4567_v21, %v4556_v17  ;;  %v791_v29 = vmul.f32 %v4577_v25, %v4559_v18 }
  0x8d   : > { %686 = vrot.lane.b32.xlu1 %v675_v20, %s4437_s25  ;;  %v4575_v24 = vpop.permute.xlu0 %780  ;;  %684 = vrot.lane.b32.xlu0 %v674_v22, %s4437_s25  ;;  %v4599_v32 = vpop.permute.xlu1 %999  ;;  %v3829_v20 = vld [vmem:[%s5466_s2 + $0x48] sm:$0xff] }
  0x8e   : > { %v4583_v26 = vsel %vm784_vm2, %v4575_v24, %v4577_v25  ;;  %v789_v30 = vmul.f32 %v4575_v24, %v4572_v23  ;;  %v1008_v35 = vmul.f32 %v4599_v32, %v4559_v18 }
  0x8f   : > { %v790_v28 = vmul.f32 %v4583_v26, %v4556_v17 }
  0x91   : > { %682 = vrot.lane.b32.xlu0 %v673_v27, %s4437_s25  ;;  %800 = vrot.lane.b32.xlu1 %v790_v28, %s4438_s26  ;;  %v4597_v31 = vpop.permute.xlu0 %997  ;;  %v4620_v38 = vpop.permute.xlu1 %1115 }
  0x92   : > { %v1006_v33 = vmul.f32 %v4597_v31, %v4572_v23  ;;  %v4609_v34 = vsel %vm1001_vm3, %v4597_v31, %v4599_v32  ;;  %v1124_v40 = vmul.f32 %v4620_v38, %v4559_v18 }
  0x93   : > { %v1007_v36 = vmul.f32 %v4609_v34, %v4556_v17 }
  0x95   : > { %802 = vrot.lane.b32.xlu0 %v791_v29, %s4438_s26  ;;  %798 = vrot.lane.b32.xlu1 %v789_v30, %s4438_s26  ;;  %v4618_v37 = vpop.permute.xlu0 %1113  ;;  %v4642_v44 = vpop.permute.xlu1 %1332  ;;  %v3832_v29 = vld [vmem:[%s5466_s2 + $0x50] sm:$0xff] }
  0x96   : > { %v4626_v39 = vsel %vm1117_vm4, %v4618_v37, %v4620_v38  ;;  %v1122_v42 = vmul.f32 %v4618_v37, %v4572_v23  ;;  %v1341_v47 = vmul.f32 %v4642_v44, %v4559_v18 }
  0x97   : > { %v1123_v41 = vmul.f32 %v4626_v39, %v4556_v17 }
  0x99   : > { %901 = vrot.lane.b32.xlu0 %v4556_v17, %s4439_s12  ;;  %903 = vrot.lane.b32.xlu1 %v4559_v18, %s4439_s12  ;;  %v4640_v43 = vpop.permute.xlu0 %1330 }
  0x9a   : > { %v4649_v45 = vsel %vm1334_vm5, %v4640_v43, %v4642_v44  ;;  %v1339_v48 = vmul.f32 %v4640_v43, %v4572_v23 }
  0x9b   : > { %v1340_v46 = vmul.f32 %v4649_v45, %v4556_v17 }
  0x9d   : > { %899 = vrot.lane.b32.xlu0 %v4572_v23, %s4439_s12  ;;  %1015 = vrot.lane.b32.xlu1 %v1006_v33, %s4440_s29 }
  0xa1   : > { %1019 = vrot.lane.b32.xlu0 %v1008_v35, %s4440_s29  ;;  %1017 = vrot.lane.b32.xlu1 %v1007_v36, %s4440_s29  ;;  %v3814_v36 = vld [vmem:[%s5466_s2 + $0x10] sm:$0xff] }
  0xa5   : > { %479 = vrot.lane.b32.xlu0 %v4556_v17, %s4441_s30  ;;  %481 = vrot.lane.b32.xlu1 %v4559_v18, %s4441_s30 }
  0xa9   : > { %1135 = vrot.lane.b32.xlu1 %v1124_v40, %s4442_s14  ;;  %1133 = vrot.lane.b32.xlu0 %v1123_v41, %s4442_s14 }
  0xad   : > { %1131 = vrot.lane.b32.xlu1 %v1122_v42, %s4442_s14  ;;  %477 = vrot.lane.b32.xlu0 %v4572_v23, %s4441_s30  ;;  %v469_v42 = vmul.f32 %v4545_v12, %v4556_v17 }
  0xb1   : > { %1236 = vrot.lane.b32.xlu1 %v4559_v18, %s4443_s15  ;;  %1234 = vrot.lane.b32.xlu0 %v4556_v17, %s4443_s15  ;;  %v3815_v17 = vld [vmem:[%s5466_s2 + $0x18] sm:$0xff] }
  0xb5   : > { %1232 = vrot.lane.b32.xlu0 %v4572_v23, %s4443_s15  ;;  %1350 = vrot.lane.b32.xlu1 %v1340_v46, %s4444_s16  ;;  %v3833_v46 = vld [vmem:[%s5466_s2 + $0x58] sm:$0xff] }
  0xb9   : > { %1352 = vrot.lane.b32.xlu0 %v1341_v47, %s4444_s16  ;;  %1348 = vrot.lane.b32.xlu1 %v1339_v48, %s4444_s16  ;;  %v468_v47 = vmul.f32 %v4542_v11, %v4572_v23  ;;  %v3836_v23 = vld [vmem:[%s5466_s2 + $0x60] sm:$0xff] }
  0xbd   : > { %1450 = vperm.xlu0 %4180, %v1446_v49   ;;  %1455 = vperm.xlu1 %4181, %v1447_v50  }
  0xff   : > { %v687_v52 = vpop.permute.xlu1 %686  ;;  %v685_v53 = vpop.permute.xlu0 %684 }
 0x100   : > { %v4673_v54 = vsel %vm688_vm6, %v685_v53, %v687_v52 }
 0x101   : > { %699 = vmatprep.subr.mxu0 %v4673_v54 }
 0x103   : > { %v801_v55 = vpop.permute.xlu1 %800  ;;  %v683_v56 = vpop.permute.xlu0 %682 }
 0x104   : > { %v4680_v58 = vsel %vm688_vm6, %v683_v56, %v685_v53  ;;  %v470_v53 = vld [vmem:[%s5466_s2] sm:$0xff] }
 0x105   : > { %700 = vmatpush1.msra.mxu0 %v4680_v58 }
 0x106   : > { %3822 = vmatmul.mubr.msk.f32.vlgmr.msra.gmra.mrb[0].mxu0 %vm488_vm7, %v3820_v57 }
 0x107   : > { %v799_v59 = vpop.permute.xlu1 %798  ;;  %v803_v60 = vpop.permute.xlu0 %802  ;;  %879 = vmatprep.mubr.f32.mxu0 %v4436_v15 }
 0x108   : > { %v805_v61 = vsel %vm804_vm8, %v799_v59, %v801_v55  ;;  %v806_v62 = vsel %vm804_vm8, %v801_v55, %v803_v60  ;;  %v3837_v55 = vld [vmem:[%s5466_s2 + $0x68] sm:$0xff] }
 0x109   : > { %815 = vmatprep.subr.mxu0 %v806_v62  ;;  %v471_v59 = vld [vmem:[%s5466_s2 + $0x8] sm:$0xff]  ;;  %v3841_v62 = vld [vmem:[%s5466_s2 + $0x78] sm:$0xff] }
 0x10a   : > { %816 = vmatpush1.msra.mxu0 %v805_v61  ;;  %v3840_v61 = vld [vmem:[%s5466_s2 + $0x70] sm:$0xff] }
 0x10b   : > { %v904_v63 = vpop.permute.xlu1 %903  ;;  %v902_v0 = vpop.permute.xlu0 %901 }
 0x10c   : > { %v907_v2 = vsel %vm905_vm9, %v902_v0, %v904_v63  ;;  %v3821_v63 = vld [vmem:[%s5466_s2 + $0x28] sm:$0xff] }
 0x10d   : > { %916 = vmatprep.subr.mxu0 %v907_v2 }
 0x10e   : > { %3826 = vmatmul.mubr.msk.f32.vlgmr.msra.gmra.mrb[0].mxu0 %vm488_vm7, %v3824_v1  ;;  %v3845_v1 = vld [vmem:[%s5466_s2 + $0x88] sm:$0xff] }
 0x10f   : > { %v1016_v3 = vpop.permute.xlu1 %1015  ;;  %v900_v4 = vpop.permute.xlu0 %899  ;;  %885 = vmatprep.mubr.f32.mxu0 %v4436_v15 }
 0x110   : > { %v906_v6 = vsel %vm905_vm9, %v900_v4, %v902_v0  ;;  %v3844_v0 = vld [vmem:[%s5466_s2 + $0x80] sm:$0xff] }
 0x111   : > { %917 = vmatpush1.msra.mxu0 %v906_v6 }
 0x112   : > { %3827 = vmatmul.mubr.msk.f32.gmra.mrb[2].mxu0 %vm488_vm7, %v3825_v5 }
 0x113   : > { %v1018_v7 = vpop.permute.xlu1 %1017  ;;  %v1020_v8 = vpop.permute.xlu0 %1019  ;;  %980 = vmatprep.mubr.f32.mxu0 %v4436_v15 }
 0x114   : > { %v1022_v10 = vsel %vm1021_vm10, %v1016_v3, %v1018_v7  ;;  %v1023_v13 = vsel %vm1021_vm10, %v1018_v7, %v1020_v8 }
 0x115   : > { %1032 = vmatprep.subr.mxu0 %v1023_v13 }
 0x116   : > { %3830 = vmatmul.mubr.msk.f32.vlgmr.msra.gmra.mrb[0].mxu0 %vm488_vm7, %v3828_v9 }
 0x117   : > { %1033 = vmatpush1.msra.mxu0 %v1022_v10  ;;  %v482_v16 = vpop.permute.xlu1 %481  ;;  %v480_v18 = vpop.permute.xlu0 %479  ;;  %986 = vmatprep.mubr.f32.mxu0 %v4436_v15 }
 0x118   : > { %v485_v22 = vsel %vm483_vm11, %v480_v18, %v482_v16 }
 0x119   : > { %495 = vmatprep.subr.mxu1 %v485_v22 }
 0x11a   : > { %3831 = vmatmul.mubr.msk.f32.gmra.mrb[2].mxu0 %vm488_vm7, %v3829_v20 }
 0x11b   : > { %v1136_v27 = vpop.permute.xlu1 %1135  ;;  %v1134_v28 = vpop.permute.xlu0 %1133  ;;  %1096 = vmatprep.mubr.f32.mxu0 %v4436_v15 }
 0x11c   : > { %v1139_v30 = vsel %vm1137_vm12, %v1134_v28, %v1136_v27 }
 0x11d   : > { %1148 = vmatprep.subr.mxu0 %v1139_v30 }
 0x11e   : > { %3834 = vmatmul.mubr.msk.f32.vlgmr.msra.gmra.mrb[0].mxu0 %vm488_vm7, %v3832_v29 }
 0x11f   : > { %v1132_v33 = vpop.permute.xlu1 %1131  ;;  %v478_v35 = vpop.permute.xlu0 %477  ;;  %1102 = vmatprep.mubr.f32.mxu0 %v4436_v15 }
 0x120   : > { %v1138_v40 = vsel %vm1137_vm12, %v1132_v33, %v1134_v28  ;;  %v484_v41 = vsel %vm483_vm11, %v478_v35, %v480_v18 }
 0x121   : > { %496 = vmatpush1.msra.mxu1 %v484_v41  ;;  %1149 = vmatpush1.msra.mxu0 %v1138_v40 }
 0x122   : > { %3816 = vmatmul.mubr.msk.f32.vlgmr.msra.gmra.mrb[0].mxu1 %vm488_vm7, %v3814_v36  ;;  %578 = vmatprep.subr.mxu1 %v469_v42 }
 0x123   : > { %3835 = vmatmul.mubr.msk.f32.gmra.mrb[2].mxu0 %vm488_vm7, %v3833_v46  ;;  %v1237_v48 = vpop.permute.xlu1 %1236  ;;  %579 = vmatpush1.msra.mxu1 %v468_v47  ;;  %v1235_v49 = vpop.permute.xlu0 %1234 }
 0x124   : > { %4072 = vmatprep.subr.mxu1 %v4673_v54  ;;  %565 = vmatprep.mubr.f32.mxu1 %v4436_v15  ;;  %v1240_v50 = vsel %vm1238_vm13, %v1235_v49, %v1237_v48 }
 0x125   : > { %1212 = vmatprep.mubr.f32.mxu0 %v4436_v15  ;;  %1249 = vmatprep.subr.mxu0 %v1240_v50 }
 0x126   : > { %3817 = vmatmul.mubr.msk.f32.gmra.mrb[2].mxu1 %vm488_vm7, %v3815_v17 }
 0x127   : > { %3838 = vmatmul.mubr.msk.f32.vlgmr.msra.gmra.mrb[0].mxu0 %vm488_vm7, %v3836_v23  ;;  %v1351_v51 = vpop.permute.xlu1 %1350  ;;  %v1233_v52 = vpop.permute.xlu0 %1232  ;;  %642 = vmatprep.mubr.f32.mxu1 %v4436_v15 }
 0x128   : > { %v1239_v54 = vsel %vm1238_vm13, %v1233_v52, %v1235_v49  ;;  %1218 = vmatprep.mubr.f32.mxu0 %v4436_v15 }
 0x129   : > { %1250 = vmatpush1.msra.mxu0 %v1239_v54 }
 0x12a   : > { %3818 = vmatmul.mubr.msk.f32.vlgmr.msra.gmra.mrb[0].mxu1 %vm488_vm7, %v470_v53 }
 0x12b   : > { %4073 = vmatpush1.msra.mxu1 %v4680_v58  ;;  %3839 = vmatmul.mubr.msk.f32.gmra.mrb[2].mxu0 %vm488_vm7, %v3837_v55  ;;  %v1349_v56 = vpop.permute.xlu1 %1348  ;;  %v1353_v57 = vpop.permute.xlu0 %1352 }
 0x12c   : > { %648 = vmatprep.mubr.f32.mxu1 %v4436_v15  ;;  %1313 = vmatprep.mubr.f32.mxu0 %v4436_v15  ;;  %v1356_v60 = vsel %vm1354_vm14, %v1351_v51, %v1353_v57  ;;  %v1355_v58 = vsel %vm1354_vm14, %v1349_v56, %v1351_v51 }
 0x12d   : > { %1365 = vmatprep.subr.mxu0 %v1356_v60 }
 0x12e   : > { %3819 = vmatmul.mubr.msk.f32.gmra.mrb[2].mxu1 %vm488_vm7, %v471_v59 }
 0x12f   : > { %3842 = vmatmul.mubr.msk.f32.vlgmr.msra.gmra.mrb[0].mxu0 %vm488_vm7, %v3840_v61  ;;  %769 = vmatprep.mubr.f32.mxu1 %v4436_v15 }
 0x130   : > { %1366 = vmatpush1.msra.mxu0 %v1355_v58  ;;  %1319 = vmatprep.mubr.f32.mxu0 %v4436_v15 }
 0x133   : > { %3843 = vmatmul.mubr.msk.f32.gmra.mrb[2].mxu0 %vm488_vm7, %v3841_v62 }
 0x134   : > { %1429 = vmatprep.mubr.f32.mxu0 %v4436_v15 }
 0x136   : > { %3823 = vmatmul.mubr.msk.f32.vlgmr.msra.gmra.mrb[2].mxu1 %vm488_vm7, %v3821_v63 }
 0x137   : > { %3846 = vmatmul.mubr.msk.f32.vlgmr.msra.gmra.mrb[0].mxu0 %vm488_vm7, %v3844_v0  ;;  %1593 = vmatprep.mubr.f32.mxu1 %v4436_v15 }
 0x138   : > { %1435 = vmatprep.mubr.f32.mxu0 %v4436_v15 }
 0x13b   : > { %3847 = vmatmul.mubr.msk.f32.gmra.mrb[2].mxu0 %vm488_vm7, %v3845_v1 }
 0x13c   : > { %2666 = vmatprep.mubr.f32.mxu0 %v4436_v15  ;;  %v1451_v5 = vpop.permute.xlu0 %1450  ;;  %v1456_v20 = vpop.permute.xlu1 %1455 }
 0x1fd   : > { %v644_v2 = vpop.f32.mrb[0].mxu1 }
 0x1fe   : > { %v646_v3 = vpop.f32.mrb[1].mxu1 }
 0x209   : > { %v771_v4 = vpop.f32.mrb[2].mxu1 }
 0x20a   : > { %v1431_v6 = vpop.f32.mrb[0].mxu0  ;;  %v773_v7 = vpop.f32.mrb[3].mxu1 }
 0x20b   : > { %v4074_v8 = vadd.f32 %v1431_v6, %v644_v2  ;;  %v1433_v9 = vpop.f32.mrb[1].mxu0 }
 0x20c   : > { %v4075_v10 = vadd.f32 %v1433_v9, %v646_v3 }
 0x20d   : > { %v1458_v13 = vadd.f32 %v4074_v8, %v1451_v5 }
 0x20e   : > { %v1459_v16 = vadd.f32 %v4075_v10, %v1451_v5  ;;  %v1437_v18 = vpop.f32.mrb[2].mxu0 }
 0x20f   : > { %v1462_v22 = vmax.f32 %v1458_v13, 0.0  ;;  %v4076_v27 = vadd.f32 %v1437_v18, %v771_v4  ;;  %v1439_v28 = vpop.f32.mrb[3].mxu0 }
 0x210   : > { %v1463_v29 = vmax.f32 %v1459_v16, 0.0  ;;  %v4077_v30 = vadd.f32 %v1439_v28, %v773_v7 }
 0x211   : > { %v1460_v33 = vadd.f32 %v4076_v27, %v1456_v20  ;;  %1470 = vrot.lane.b32.xlu1 %v1462_v22, %s4430_s17 }
 0x212   : > { %v1461_v35 = vadd.f32 %v4077_v30, %v1456_v20  ;;  %1472 = vrot.lane.b32.xlu0 %v1463_v29, %s4430_s17 }
 0x213   : > { %v1464_v36 = vmax.f32 %v1460_v33, 0.0 }
 0x214   : > { %v1465_v40 = vmax.f32 %v1461_v35, 0.0 }
 0x215   : > { %1474 = vrot.lane.b32.xlu1 %v1464_v36, %s4430_s17 }
 0x216   : > { %1476 = vrot.lane.b32.xlu0 %v1465_v40, %s4430_s17 }
 0x283   : > { %v1471_v41 = vpop.permute.xlu1 %1470 }
 0x284   : > { %v1473_v42 = vpop.permute.xlu0 %1472  ;;  %v4805_v17 = vsel %vm450_vm1, 0.0, %v1471_v41 }
 0x285   : > { %v4795_v46 = vsel %vm450_vm1, %v1471_v41, %v1473_v42  ;;  %v4798_v47 = vsel %vm450_vm1, %v1473_v42, 0.0  ;;  %v1689_v0 = vmul.f32 %v4805_v17, %v4551_v14  ;;  %v1811_v8 = vmul.f32 %v4805_v17, %v4575_v24 }
 0x286   : > { %v4802_v48 = vpack.i.bf16 %v4798_v47, %v4795_v46  ;;  %v1690_v54 = vmul.f32 %v4795_v46, %v4567_v21  ;;  %v1691_v56 = vmul.f32 %v4798_v47, %v4561_v19  ;;  %v1812_v60 = vmul.f32 %v4795_v46, %v4583_v26 }
 0x287   : > { %v1475_v49 = vpop.permute.xlu1 %1474  ;;  %v1813_v61 = vmul.f32 %v4798_v47, %v4577_v25  ;;  %v4856_v6 = vmul.f32 %v4795_v46, %v4545_v12  ;;  %v4870_v10 = vmul.f32 %v4805_v17, %v4542_v11  ;;  %v2044_v22 = vmul.f32 %v4795_v46, %v4609_v34 }
 0x288   : > { %v4808_v50 = vsel %vm450_vm1, 0.0, %v1475_v49  ;;  %v1477_v23 = vpop.permute.xlu0 %1476  ;;  %4183 = vrot.lane.b32.xlu1 %v4802_v48, %s4441_s30  ;;  %v4197_v58 = vpack.i.bf16 %v1691_v56, %v1690_v54  ;;  %v2045_v27 = vmul.f32 %v4798_v47, %v4599_v32  ;;  %v2043_v35 = vmul.f32 %v4805_v17, %v4597_v31 }
 0x289   : > { %v4813_v51 = vsel %vm450_vm1, %v1475_v49, %v1477_v23  ;;  %v4816_v52 = vsel %vm450_vm1, %v1477_v23, 0.0  ;;  %v4820_v53 = vpack.i.bf16 %v4808_v50, %v4805_v17  ;;  %v1692_v63 = vmul.f32 %v4808_v50, %v4551_v14 }
 0x28a   : > { %v4826_v55 = vpack.i.bf16 %v4816_v52, %v4813_v51  ;;  %v1693_v57 = vmul.f32 %v4813_v51, %v4567_v21  ;;  %v1694_v59 = vmul.f32 %v4816_v52, %v4561_v19  ;;  %v4212_v1 = vpack.i.bf16 %v1813_v61, %v1812_v60 }
 0x28b   : > { %v4207_v2 = vpack.i.bf16 %v1692_v63, %v1689_v0  ;;  %v1815_v3 = vmul.f32 %v4813_v51, %v4583_v26  ;;  %v1816_v4 = vmul.f32 %v4816_v52, %v4577_v25  ;;  %v1814_v5 = vmul.f32 %v4808_v50, %v4575_v24 }
 0x28c   : > { %4193 = vrot.lane.b32.xlu1 %v4820_v53, %s4441_s30  ;;  %4188 = vrot.lane.b32.xlu0 %v4826_v55, %s4441_s30  ;;  %v4202_v62 = vpack.i.bf16 %v1694_v59, %v1693_v57  ;;  %v4860_v7 = vmul.f32 %v4813_v51, %v4545_v12  ;;  %v4874_v13 = vmul.f32 %v4808_v50, %v4542_v11 }
 0x28d   : > { %v4217_v16 = vpack.i.bf16 %v1816_v4, %v1815_v3  ;;  %v4222_v18 = vpack.i.bf16 %v1814_v5, %v1811_v8  ;;  %v4242_v28 = vpack.i.bf16 %v2045_v27, %v2044_v22  ;;  %v2047_v29 = vmul.f32 %v4813_v51, %v4609_v34 }
 0x28e   : > { %v3969_v9 = vpack.c.bf16 %v4860_v7, %v4856_v6  ;;  %v3971_v20 = vpack.c.bf16 %v4874_v13, %v4870_v10  ;;  %v2048_v30 = vmul.f32 %v4816_v52, %v4599_v32  ;;  %v2046_v33 = vmul.f32 %v4808_v50, %v4597_v31  ;;  %v1494_v10 = vld [vmem:[%s5468_s4] sm:$0xff] }
 0x28f   : > { %v2166_v36 = vmul.f32 %v4795_v46, %v4626_v39  ;;  %v2167_v40 = vmul.f32 %v4798_v47, %v4620_v38  ;;  %v2169_v49 = vmul.f32 %v4813_v51, %v4626_v39  ;;  %v2170_v23 = vmul.f32 %v4816_v52, %v4620_v38 }
 0x290   : > { %4198 = vrot.lane.b32.xlu0 %v4197_v58, %s4437_s25  ;;  %4203 = vrot.lane.b32.xlu1 %v4202_v62, %s4437_s25  ;;  %v4247_v41 = vpack.i.bf16 %v2048_v30, %v2047_v29  ;;  %v4252_v42 = vpack.i.bf16 %v2046_v33, %v2043_v35  ;;  %v2168_v57 = vmul.f32 %v4808_v50, %v4618_v37 }
 0x291   : > { %v4257_v54 = vpack.i.bf16 %v2167_v40, %v2166_v36  ;;  %v4262_v56 = vpack.i.bf16 %v2170_v23, %v2169_v49  ;;  %v2165_v59 = vmul.f32 %v4805_v17, %v4618_v37  ;;  %v2398_v61 = vmul.f32 %v4795_v46, %v4649_v45 }
 0x292   : > { %v2399_v58 = vmul.f32 %v4798_v47, %v4642_v44  ;;  %v2401_v62 = vmul.f32 %v4813_v51, %v4649_v45  ;;  %v2402_v63 = vmul.f32 %v4816_v52, %v4642_v44  ;;  %v2400_v46 = vmul.f32 %v4808_v50, %v4640_v43  ;;  %v2519_v51 = vld [vmem:[%s5469_s5] sm:$0xff] }
 0x293   : > { %v4267_v60 = vpack.i.bf16 %v2168_v57, %v2165_v59  ;;  %v2397_v47 = vmul.f32 %v4805_v17, %v4640_v43 }
 0x294   : > { %4208 = vrot.lane.b32.xlu0 %v4207_v2, %s4437_s25  ;;  %4213 = vrot.lane.b32.xlu1 %v4212_v1, %s4438_s26  ;;  %v4287_v0 = vpack.i.bf16 %v2399_v58, %v2398_v61 }
 0x295   : > { %v4297_v52 = vpack.i.bf16 %v2400_v46, %v2397_v47 }
 0x298   : > { %4218 = vrot.lane.b32.xlu0 %v4217_v16, %s4438_s26  ;;  %4223 = vrot.lane.b32.xlu1 %v4222_v18, %s4438_s26 }
 0x29c   : > { %4228 = vrot.lane.b32.xlu0 %v4802_v48, %s4439_s12  ;;  %4233 = vrot.lane.b32.xlu1 %v4826_v55, %s4439_s12 }
 0x2a0   : > { %4238 = vrot.lane.b32.xlu0 %v4820_v53, %s4439_s12  ;;  %4243 = vrot.lane.b32.xlu1 %v4242_v28, %s4440_s29 }
 0x2a4   : > { %4248 = vrot.lane.b32.xlu0 %v4247_v41, %s4440_s29  ;;  %4253 = vrot.lane.b32.xlu1 %v4252_v42, %s4440_s29  ;;  %v3848_v42 = vld [vmem:[%s5468_s4 + $0x10] sm:$0xff] }
 0x2a8   : > { %4258 = vrot.lane.b32.xlu0 %v4257_v54, %s4442_s14  ;;  %4263 = vrot.lane.b32.xlu1 %v4262_v56, %s4442_s14 }
 0x2ac   : > { %4268 = vrot.lane.b32.xlu0 %v4267_v60, %s4442_s14  ;;  %4273 = vrot.lane.b32.xlu1 %v4802_v48, %s4443_s15  ;;  %v4292_v48 = vpack.i.bf16 %v2402_v63, %v2401_v62  ;;  %v3849_v62 = vld [vmem:[%s5468_s4 + $0x18] sm:$0xff] }
 0x2b0   : > { %4278 = vrot.lane.b32.xlu0 %v4826_v55, %s4443_s15  ;;  %4283 = vrot.lane.b32.xlu1 %v4820_v53, %s4443_s15  ;;  %v2520_v53 = vld [vmem:[%s5469_s5 + $0x8] sm:$0xff] }
 0x2b4   : > { %4288 = vrot.lane.b32.xlu0 %v4287_v0, %s4444_s16  ;;  %4293 = vrot.lane.b32.xlu1 %v4292_v48, %s4444_s16 }
 0x2b8   : > { %4298 = vrot.lane.b32.xlu0 %v4297_v52, %s4444_s16  ;;  %2523 = vperm.xlu1 %4181, %v2519_v51  }
 0x2bc   : > { %2528 = vperm.xlu0 %4180, %v2520_v53  }
 0x2fa   : > { %v4184_v50 = vpop.permute.xlu1 %4183 }
 0x2fb   : > { %v4186_v55 = vunpack.i.h.bf16 %v4184_v50  ;;  %v4185_v1 = vunpack.i.l.bf16 %v4184_v50 }
 0x2fd   : > { %v1516_v22 = vsel %vm483_vm11, %v4185_v1, %v4186_v55 }
 0x2fe   : > { %v4189_v2 = vpop.permute.xlu0 %4188  ;;  %v4194_v3 = vpop.permute.xlu1 %4193 }
 0x2ff   : > { %v4191_v4 = vunpack.i.h.bf16 %v4189_v2  ;;  %v4190_v17 = vunpack.i.l.bf16 %v4189_v2  ;;  %v4196_v5 = vunpack.i.h.bf16 %v4194_v3  ;;  %v4195_v8 = vunpack.i.l.bf16 %v4194_v3 }
 0x301   : > { %v1517_v16 = vsel %vm483_vm11, %v4196_v5, %v4190_v17  ;;  %v1515_v18 = vsel %vm483_vm11, %v4195_v8, %v4185_v1  ;;  %v1518_v27 = vsel %vm483_vm11, %v4190_v17, %v4191_v4  ;;  %v1495_v4 = vld [vmem:[%s5468_s4 + $0x8] sm:$0xff] }
 0x302   : > { %v3967_v28 = vpack.c.bf16 %v1517_v16, %v1515_v18  ;;  %v4199_v29 = vpop.permute.xlu0 %4198  ;;  %v4204_v30 = vpop.permute.xlu1 %4203  ;;  %v3965_v33 = vpack.c.bf16 %v1518_v27, %v1516_v22  ;;  %v3854_v18 = vld [vmem:[%s5468_s4 + $0x20] sm:$0xff] }
 0x303   : > { %v4201_v35 = vunpack.i.h.bf16 %v4199_v29  ;;  %v4200_v36 = vunpack.i.l.bf16 %v4199_v29  ;;  %v4206_v40 = vunpack.i.h.bf16 %v4204_v30  ;;  %v4205_v41 = vunpack.i.l.bf16 %v4204_v30 }
 0x304   : > { %3966 = vmatprep.subr.bf16.mxu1 %v3965_v33 }
 0x305   : > { %3968 = vmatpush1.bf16.msra.mxu1 %v3967_v28  ;;  %v1717_v49 = vsel %vm688_vm6, %v4200_v36, %v4201_v35  ;;  %v1719_v23 = vsel %vm688_vm6, %v4205_v41, %v4206_v40 }
 0x306   : > { %v4209_v54 = vpop.permute.xlu0 %4208  ;;  %v4214_v56 = vpop.permute.xlu1 %4213  ;;  %3970 = vmatprep.subr.bf16.mxu1 %v3969_v9  ;;  %v3973_v60 = vpack.c.bf16 %v1719_v23, %v1717_v49 }
 0x307   : > { %v4211_v57 = vunpack.i.h.bf16 %v4209_v54  ;;  %v4210_v59 = vunpack.i.l.bf16 %v4209_v54  ;;  %v4216_v61 = vunpack.i.h.bf16 %v4214_v56  ;;  %v4215_v58 = vunpack.i.l.bf16 %v4214_v56 }
 0x308   : > { %3850 = vmatmul.mubr.msk.f32.vlgmr.msra.gmra.mrb[4].mxu1 %vm784_vm2, %v3848_v42  ;;  %v3855_v42 = vld [vmem:[%s5468_s4 + $0x28] sm:$0xff] }
 0x309   : > { %3972 = vmatpush1.bf16.msra.mxu1 %v3971_v20  ;;  %1599 = vmatprep.mubr.f32.mxu1 %v4436_v15  ;;  %v1716_v0 = vsel %vm688_vm6, %v4210_v59, %v4200_v36  ;;  %v1718_v48 = vsel %vm688_vm6, %v4211_v57, %v4205_v41  ;;  %v1839_v13 = vsel %vm804_vm8, %v4215_v58, %v4216_v61 }
 0x30a   : > { %v4219_v63 = vpop.permute.xlu0 %4218  ;;  %v4224_v6 = vpop.permute.xlu1 %4223  ;;  %3974 = vmatprep.subr.bf16.mxu1 %v3973_v60  ;;  %v3975_v52 = vpack.c.bf16 %v1718_v48, %v1716_v0  ;;  %v3858_v60 = vld [vmem:[%s5468_s4 + $0x30] sm:$0xff] }
 0x30b   : > { %v4221_v7 = vunpack.i.h.bf16 %v4219_v63  ;;  %v4220_v9 = vunpack.i.l.bf16 %v4219_v63  ;;  %v4226_v53 = vunpack.i.h.bf16 %v4224_v6  ;;  %v4225_v50 = vunpack.i.l.bf16 %v4224_v6 }
 0x30c   : > { %3851 = vmatmul.mubr.msk.f32.gmra.mrb[6].mxu1 %vm784_vm2, %v3849_v62 }
 0x30d   : > { %1676 = vmatprep.mubr.f32.mxu1 %v4436_v15  ;;  %v1841_v20 = vsel %vm804_vm8, %v4220_v9, %v4221_v7  ;;  %v1840_v8 = vsel %vm804_vm8, %v4226_v53, %v4220_v9  ;;  %v1838_v16 = vsel %vm804_vm8, %v4225_v50, %v4215_v58 }
 0x30e   : > { %v4229_v46 = vpop.permute.xlu0 %4228  ;;  %v4234_v47 = vpop.permute.xlu1 %4233  ;;  %v3977_v51 = vpack.c.bf16 %v1841_v20, %v1839_v13  ;;  %v3979_v30 = vpack.c.bf16 %v1840_v8, %v1838_v16  ;;  %v3859_v20 = vld [vmem:[%s5468_s4 + $0x38] sm:$0xff]  ;;  %v3863_v16 = vld [vmem:[%s5468_s4 + $0x48] sm:$0xff] }
 0x30f   : > { %v4231_v55 = vunpack.i.h.bf16 %v4229_v46  ;;  %v4230_v1 = vunpack.i.l.bf16 %v4229_v46  ;;  %v4236_v2 = vunpack.i.h.bf16 %v4234_v47  ;;  %v4235_v3 = vunpack.i.l.bf16 %v4234_v47 }
 0x310   : > { %3852 = vmatmul.mubr.msk.f32.vlgmr.msra.gmra.mrb[4].mxu1 %vm784_vm2, %v1494_v10 }
 0x311   : > { %3976 = vmatpush1.bf16.msra.mxu1 %v3975_v52  ;;  %1682 = vmatprep.mubr.f32.mxu1 %v4436_v15  ;;  %v1949_v22 = vsel %vm905_vm9, %v4230_v1, %v4231_v55  ;;  %v1951_v27 = vsel %vm905_vm9, %v4235_v3, %v4236_v2  ;;  %v3862_v52 = vld [vmem:[%s5468_s4 + $0x40] sm:$0xff] }
 0x312   : > { %3978 = vmatprep.subr.bf16.mxu1 %v3977_v51  ;;  %v4239_v17 = vpop.permute.xlu0 %4238  ;;  %v4244_v5 = vpop.permute.xlu1 %4243  ;;  %v3981_v36 = vpack.c.bf16 %v1951_v27, %v1949_v22 }
 0x313   : > { %v4241_v33 = vunpack.i.h.bf16 %v4239_v17  ;;  %v4240_v35 = vunpack.i.l.bf16 %v4239_v17  ;;  %v4246_v23 = vunpack.i.h.bf16 %v4244_v5  ;;  %v4245_v54 = vunpack.i.l.bf16 %v4244_v5 }
 0x314   : > { %3853 = vmatmul.mubr.msk.f32.gmra.mrb[6].mxu1 %vm784_vm2, %v1495_v4 }
 0x315   : > { %1794 = vmatprep.mubr.f32.mxu1 %v4436_v15  ;;  %v1948_v56 = vsel %vm905_vm9, %v4240_v35, %v4230_v1  ;;  %v1950_v57 = vsel %vm905_vm9, %v4241_v33, %v4235_v3  ;;  %v2071_v62 = vsel %vm1021_vm10, %v4245_v54, %v4246_v23 }
 0x316   : > { %v4249_v28 = vpop.permute.xlu0 %4248  ;;  %v4254_v29 = vpop.permute.xlu1 %4253  ;;  %v3983_v58 = vpack.c.bf16 %v1950_v57, %v1948_v56 }
 0x317   : > { %v4251_v40 = vunpack.i.h.bf16 %v4249_v28  ;;  %v4250_v41 = vunpack.i.l.bf16 %v4249_v28  ;;  %v4256_v63 = vunpack.i.h.bf16 %v4254_v29  ;;  %v4255_v6 = vunpack.i.l.bf16 %v4254_v29  ;;  %v3866_v29 = vld [vmem:[%s5468_s4 + $0x50] sm:$0xff] }
 0x318   : > { %3856 = vmatmul.mubr.msk.f32.vlgmr.msra.gmra.mrb[4].mxu1 %vm784_vm2, %v3854_v18 }
 0x319   : > { %3980 = vmatpush1.bf16.msra.mxu1 %v3979_v30  ;;  %1800 = vmatprep.mubr.f32.mxu1 %v4436_v15  ;;  %v2073_v61 = vsel %vm1021_vm10, %v4250_v41, %v4251_v40  ;;  %v2072_v47 = vsel %vm1021_vm10, %v4256_v63, %v4250_v41  ;;  %v2070_v51 = vsel %vm1021_vm10, %v4255_v6, %v4245_v54 }
 0x31a   : > { %3982 = vmatprep.subr.bf16.mxu1 %v3981_v36  ;;  %v4259_v49 = vpop.permute.xlu0 %4258  ;;  %v4264_v59 = vpop.permute.xlu1 %4263  ;;  %v3985_v9 = vpack.c.bf16 %v2073_v61, %v2071_v62  ;;  %v3987_v1 = vpack.c.bf16 %v2072_v47, %v2070_v51  ;;  %v3870_v62 = vld [vmem:[%s5468_s4 + $0x60] sm:$0xff]  ;;  %v3875_v51 = vld [vmem:[%s5468_s4 + $0x78] sm:$0xff] }
 0x31b   : > { %v4261_v0 = vunpack.i.h.bf16 %v4259_v49  ;;  %v4260_v48 = vunpack.i.l.bf16 %v4259_v49  ;;  %v4266_v10 = vunpack.i.h.bf16 %v4264_v59  ;;  %v4265_v13 = vunpack.i.l.bf16 %v4264_v59  ;;  %v3867_v59 = vld [vmem:[%s5468_s4 + $0x58] sm:$0xff] }
 0x31c   : > { %3857 = vmatmul.mubr.msk.f32.gmra.mrb[6].mxu1 %vm784_vm2, %v3855_v42 }
 0x31d   : > { %1916 = vmatprep.mubr.f32.mxu1 %v4436_v15  ;;  %v2193_v53 = vsel %vm1137_vm12, %v4260_v48, %v4261_v0  ;;  %v2195_v50 = vsel %vm1137_vm12, %v4265_v13, %v4266_v10  ;;  %v3871_v10 = vld [vmem:[%s5468_s4 + $0x68] sm:$0xff] }
 0x31e   : > { %v4269_v7 = vpop.permute.xlu0 %4268  ;;  %v4274_v46 = vpop.permute.xlu1 %4273  ;;  %v3989_v17 = vpack.c.bf16 %v2195_v50, %v2193_v53  ;;  %v3879_v53 = vld [vmem:[%s5468_s4 + $0x88] sm:$0xff] }
 0x31f   : > { %v4271_v2 = vunpack.i.h.bf16 %v4269_v7  ;;  %v4270_v3 = vunpack.i.l.bf16 %v4269_v7  ;;  %v4276_v18 = vunpack.i.h.bf16 %v4274_v46  ;;  %v4275_v22 = vunpack.i.l.bf16 %v4274_v46  ;;  %v3874_v46 = vld [vmem:[%s5468_s4 + $0x70] sm:$0xff] }
 0x320   : > { %3860 = vmatmul.mubr.msk.f32.vlgmr.msra.gmra.mrb[4].mxu1 %vm784_vm2, %v3858_v60 }
 0x321   : > { %3984 = vmatpush1.bf16.msra.mxu1 %v3983_v58  ;;  %1922 = vmatprep.mubr.f32.mxu1 %v4436_v15  ;;  %v2192_v27 = vsel %vm1137_vm12, %v4270_v3, %v4260_v48  ;;  %v2194_v28 = vsel %vm1137_vm12, %v4271_v2, %v4265_v13  ;;  %v2303_v40 = vsel %vm1238_vm13, %v4275_v22, %v4276_v18 }
 0x322   : > { %3986 = vmatprep.subr.bf16.mxu1 %v3985_v9  ;;  %v4279_v55 = vpop.permute.xlu0 %4278  ;;  %v4284_v4 = vpop.permute.xlu1 %4283  ;;  %v3991_v36 = vpack.c.bf16 %v2194_v28, %v2192_v27 }
 0x323   : > { %v4281_v5 = vunpack.i.h.bf16 %v4279_v55  ;;  %v4280_v8 = vunpack.i.l.bf16 %v4279_v55  ;;  %v4286_v41 = vunpack.i.h.bf16 %v4284_v4  ;;  %v4285_v42 = vunpack.i.l.bf16 %v4284_v4 }
 0x324   : > { %3861 = vmatmul.mubr.msk.f32.gmra.mrb[6].mxu1 %vm784_vm2, %v3859_v20 }
 0x325   : > { %2026 = vmatprep.mubr.f32.mxu1 %v4436_v15  ;;  %v2305_v30 = vsel %vm1238_vm13, %v4280_v8, %v4281_v5  ;;  %v2304_v60 = vsel %vm1238_vm13, %v4286_v41, %v4280_v8  ;;  %v2302_v61 = vsel %vm1238_vm13, %v4285_v42, %v4275_v22 }
 0x326   : > { %v4289_v33 = vpop.permute.xlu0 %4288  ;;  %v4294_v35 = vpop.permute.xlu1 %4293  ;;  %v3993_v49 = vpack.c.bf16 %v2305_v30, %v2303_v40  ;;  %v3995_v7 = vpack.c.bf16 %v2304_v60, %v2302_v61 }
 0x327   : > { %v4291_v23 = vunpack.i.h.bf16 %v4289_v33  ;;  %v4290_v54 = vunpack.i.l.bf16 %v4289_v33  ;;  %v4296_v56 = vunpack.i.h.bf16 %v4294_v35  ;;  %v4295_v57 = vunpack.i.l.bf16 %v4294_v35 }
 0x328   : > { %3864 = vmatmul.mubr.msk.f32.vlgmr.msra.gmra.mrb[4].mxu1 %vm784_vm2, %v3862_v52  ;;  %v3878_v52 = vld [vmem:[%s5468_s4 + $0x80] sm:$0xff] }
 0x329   : > { %3988 = vmatpush1.bf16.msra.mxu1 %v3987_v1  ;;  %2032 = vmatprep.mubr.f32.mxu1 %v4436_v15  ;;  %v2425_v63 = vsel %vm1354_vm14, %v4290_v54, %v4291_v23  ;;  %v2427_v6 = vsel %vm1354_vm14, %v4295_v57, %v4296_v56 }
 0x32a   : > { %3990 = vmatprep.subr.bf16.mxu1 %v3989_v17  ;;  %v4299_v58 = vpop.permute.xlu0 %4298  ;;  %v3997_v48 = vpack.c.bf16 %v2427_v6, %v2425_v63 }
 0x32b   : > { %v4301_v9 = vunpack.i.h.bf16 %v4299_v58  ;;  %v4300_v0 = vunpack.i.l.bf16 %v4299_v58 }
 0x32c   : > { %3865 = vmatmul.mubr.msk.f32.gmra.mrb[6].mxu1 %vm784_vm2, %v3863_v16 }
 0x32d   : > { %2148 = vmatprep.mubr.f32.mxu1 %v4436_v15  ;;  %v2424_v13 = vsel %vm1354_vm14, %v4300_v0, %v4290_v54  ;;  %v2426_v20 = vsel %vm1354_vm14, %v4301_v9, %v4295_v57 }
 0x32e   : > { %v3999_v47 = vpack.c.bf16 %v2426_v20, %v2424_v13 }
 0x330   : > { %3868 = vmatmul.mubr.msk.f32.vlgmr.msra.gmra.mrb[4].mxu1 %vm784_vm2, %v3866_v29 }
 0x331   : > { %3992 = vmatpush1.bf16.msra.mxu1 %v3991_v36  ;;  %2154 = vmatprep.mubr.f32.mxu1 %v4436_v15 }
 0x332   : > { %3994 = vmatprep.subr.bf16.mxu1 %v3993_v49 }
 0x334   : > { %3869 = vmatmul.mubr.msk.f32.gmra.mrb[6].mxu1 %vm784_vm2, %v3867_v59 }
 0x335   : > { %2270 = vmatprep.mubr.f32.mxu1 %v4436_v15 }
 0x337   : > { %v2524_v50 = vpop.permute.xlu1 %2523 }
 0x338   : > { %3872 = vmatmul.mubr.msk.f32.vlgmr.msra.gmra.mrb[4].mxu1 %vm784_vm2, %v3870_v62 }
 0x339   : > { %3996 = vmatpush1.bf16.msra.mxu1 %v3995_v7  ;;  %2276 = vmatprep.mubr.f32.mxu1 %v4436_v15 }
 0x33a   : > { %3998 = vmatprep.subr.bf16.mxu1 %v3997_v48 }
 0x33b   : > { %v2529_v17 = vpop.permute.xlu0 %2528 }
 0x33c   : > { %3873 = vmatmul.mubr.msk.f32.gmra.mrb[6].mxu1 %vm784_vm2, %v3871_v10 }
 0x33d   : > { %2380 = vmatprep.mubr.f32.mxu1 %v4436_v15 }
 0x340   : > { %3876 = vmatmul.mubr.msk.f32.vlgmr.msra.gmra.mrb[4].mxu1 %vm784_vm2, %v3874_v46 }
 0x341   : > { %4000 = vmatpush1.bf16.msra.mxu1 %v3999_v47  ;;  %2386 = vmatprep.mubr.f32.mxu1 %v4436_v15 }
 0x344   : > { %3877 = vmatmul.mubr.msk.f32.gmra.mrb[6].mxu1 %vm784_vm2, %v3875_v51 }
 0x345   : > { %2502 = vmatprep.mubr.f32.mxu1 %v4436_v15 }
 0x348   : > { %3880 = vmatmul.mubr.msk.f32.vlgmr.msra.gmra.mrb[4].mxu1 %vm784_vm2, %v3878_v52 }
 0x349   : > { %2508 = vmatprep.mubr.f32.mxu1 %v4436_v15 }
 0x34c   : > { %3881 = vmatmul.mubr.msk.f32.gmra.mrb[6].mxu1 %vm784_vm2, %v3879_v53 }
 0x41b   : > { %v2504_v55 = vpop.f32.mrb[4].mxu1 }
 0x41c   : > { %v2531_v1 = vadd.f32 %v2524_v50, %v2504_v55  ;;  %v2506_v2 = vpop.f32.mrb[5].mxu1 }
 0x41d   : > { %v2532_v3 = vadd.f32 %v2524_v50, %v2506_v2 }
 0x41e   : > { %v2535_v4 = vmax.f32 %v2531_v1, 0.0 }
 0x41f   : > { %v2536_v5 = vmax.f32 %v2532_v3, 0.0  ;;  %v2510_v8 = vpop.f32.mrb[6].mxu1 }
 0x420   : > { %v2533_v16 = vadd.f32 %v2529_v17, %v2510_v8  ;;  %2543 = vrot.lane.b32.xlu1 %v2535_v4, %s4430_s17  ;;  %v2512_v18 = vpop.f32.mrb[7].mxu1 }
 0x421   : > { %v2534_v22 = vadd.f32 %v2529_v17, %v2512_v18  ;;  %2545 = vrot.lane.b32.xlu0 %v2536_v5, %s4430_s17 }
 0x422   : > { %v2537_v27 = vmax.f32 %v2533_v16, 0.0 }
 0x423   : > { %v2538_v28 = vmax.f32 %v2534_v22, 0.0 }
 0x424   : > { %2547 = vrot.lane.b32.xlu1 %v2537_v27, %s4430_s17 }
 0x425   : > { %2549 = vrot.lane.b32.xlu0 %v2538_v28, %s4430_s17  ;;  %s438_s17 = scalar_lea.vmem %s5477_s13, %s5479_s28 }
 0x492   : > { %v2544_v29 = vpop.permute.xlu1 %2543 }
 0x493   : > { %v2546_v30 = vpop.permute.xlu0 %2545  ;;  %v5085_v41 = vsel %vm450_vm1, 0.0, %v2544_v29 }
 0x494   : > { %v5075_v33 = vsel %vm450_vm1, %v2544_v29, %v2546_v30  ;;  %v5078_v35 = vsel %vm450_vm1, %v2546_v30, 0.0  ;;  %v3100_v2 = vmul.f32 %v5085_v41, %v4597_v31  ;;  %v3218_v18 = vmul.f32 %v5085_v41, %v4618_v37 }
 0x495   : > { %v5082_v36 = vpack.i.bf16 %v5078_v35, %v5075_v33  ;;  %v2759_v57 = vmul.f32 %v5075_v33, %v4567_v21  ;;  %v2760_v60 = vmul.f32 %v5078_v35, %v4561_v19  ;;  %v2877_v62 = vmul.f32 %v5075_v33, %v4583_v26 }
 0x496   : > { %v2548_v40 = vpop.permute.xlu1 %2547  ;;  %v2878_v63 = vmul.f32 %v5078_v35, %v4577_v25  ;;  %v5136_v20 = vmul.f32 %v5075_v33, %v4545_v12  ;;  %v3102_v53 = vmul.f32 %v5078_v35, %v4599_v32  ;;  %v3219_v3 = vmul.f32 %v5075_v33, %v4626_v39 }
 0x497   : > { %v5088_v42 = vsel %vm450_vm1, 0.0, %v2548_v40  ;;  %4303 = vrot.lane.b32.xlu1 %v5082_v36, %s4441_s30  ;;  %v2550_v49 = vpop.permute.xlu0 %2549  ;;  %v4317_v6 = vpack.i.bf16 %v2760_v60, %v2759_v57  ;;  %v3444_v22 = vmul.f32 %v5078_v35, %v4642_v44 }
 0x498   : > { %v5093_v23 = vsel %vm450_vm1, %v2548_v40, %v2550_v49  ;;  %v5096_v54 = vsel %vm450_vm1, %v2550_v49, 0.0  ;;  %v5100_v56 = vpack.i.bf16 %v5088_v42, %v5085_v41  ;;  %v4332_v9 = vpack.i.bf16 %v2878_v63, %v2877_v62 }
 0x499   : > { %v5106_v59 = vpack.i.bf16 %v5096_v54, %v5093_v23  ;;  %v2762_v61 = vmul.f32 %v5093_v23, %v4567_v21  ;;  %v2763_v58 = vmul.f32 %v5096_v54, %v4561_v19  ;;  %v2761_v21 = vmul.f32 %v5088_v42, %v4551_v14 }
 0x49a   : > { %v2758_v19 = vmul.f32 %v5085_v41, %v4551_v14  ;;  %v2880_v48 = vmul.f32 %v5093_v23, %v4583_v26  ;;  %v2881_v10 = vmul.f32 %v5096_v54, %v4577_v25  ;;  %v2879_v13 = vmul.f32 %v5088_v42, %v4575_v24 }
 0x49b   : > { %4313 = vrot.lane.b32.xlu1 %v5100_v56, %s4441_s30  ;;  %4308 = vrot.lane.b32.xlu0 %v5106_v59, %s4441_s30  ;;  %v4322_v7 = vpack.i.bf16 %v2763_v58, %v2762_v61  ;;  %v5140_v46 = vmul.f32 %v5093_v23, %v4545_v12  ;;  %v2876_v14 = vmul.f32 %v5085_v41, %v4575_v24  ;;  %vm3757_vm1 = vcmask 0  }
 0x49c   : > { %v4327_v0 = vpack.i.bf16 %v2761_v21, %v2758_v19  ;;  %v5150_v26 = vmul.f32 %v5085_v41, %v4542_v11  ;;  %v5154_v47 = vmul.f32 %v5088_v42, %v4542_v11  ;;  %v4337_v12 = vpack.i.bf16 %v2881_v10, %v2880_v48 }
 0x49d   : > { %v4005_v25 = vpack.c.bf16 %v5140_v46, %v5136_v20  ;;  %v4342_v51 = vpack.i.bf16 %v2879_v13, %v2876_v14  ;;  %v3101_v24 = vmul.f32 %v5075_v33, %v4609_v34  ;;  %v3104_v50 = vmul.f32 %v5093_v23, %v4609_v34 }
 0x49e   : > { %v4007_v52 = vpack.c.bf16 %v5154_v47, %v5150_v26  ;;  %v3105_v55 = vmul.f32 %v5096_v54, %v4599_v32  ;;  %v3103_v1 = vmul.f32 %v5088_v42, %v4597_v31  ;;  %v3220_v34 = vmul.f32 %v5078_v35, %v4620_v38  ;;  %v2567_v26 = vld [vmem:[%s5470_s6] sm:$0xff] }
 0x49f   : > { %4318 = vrot.lane.b32.xlu0 %v4317_v6, %s4437_s25  ;;  %4323 = vrot.lane.b32.xlu1 %v4322_v7, %s4437_s25  ;;  %v4362_v11 = vpack.i.bf16 %v3102_v53, %v3101_v24  ;;  %v3222_v32 = vmul.f32 %v5093_v23, %v4626_v39  ;;  %v3223_v5 = vmul.f32 %v5096_v54, %v4620_v38 }
 0x4a0   : > { %v4367_v4 = vpack.i.bf16 %v3105_v55, %v3104_v50  ;;  %v4372_v17 = vpack.i.bf16 %v3103_v1, %v3100_v2  ;;  %v4377_v8 = vpack.i.bf16 %v3220_v34, %v3219_v3  ;;  %v3221_v16 = vmul.f32 %v5088_v42, %v4618_v37 }
 0x4a1   : > { %v4382_v31 = vpack.i.bf16 %v3223_v5, %v3222_v32  ;;  %v3443_v38 = vmul.f32 %v5075_v33, %v4649_v45  ;;  %v3446_v27 = vmul.f32 %v5093_v23, %v4649_v45  ;;  %v3447_v28 = vmul.f32 %v5096_v54, %v4642_v44  ;;  %v3560_v44 = vld [vmem:[%s5471_s7] sm:$0xff] }
 0x4a2   : > { %v4387_v39 = vpack.i.bf16 %v3221_v16, %v3218_v18  ;;  %v3445_v30 = vmul.f32 %v5088_v42, %v4640_v43  ;;  %v3442_v45 = vmul.f32 %v5085_v41, %v4640_v43  ;;  %v2568_v18 = vld [vmem:[%s5470_s6 + $0x8] sm:$0xff] }
 0x4a3   : > { %4328 = vrot.lane.b32.xlu0 %v4327_v0, %s4437_s25  ;;  %4333 = vrot.lane.b32.xlu1 %v4332_v9, %s4438_s26  ;;  %v4407_v37 = vpack.i.bf16 %v3444_v22, %v3443_v38  ;;  %v4412_v29 = vpack.i.bf16 %v3447_v28, %v3446_v27  ;;  %v3882_v9 = vld [vmem:[%s5470_s6 + $0x10] sm:$0xff]  ;;  %v3888_v28 = vld [vmem:[%s5470_s6 + $0x20] sm:$0xff] }
 0x4a4   : > { %v4417_v33 = vpack.i.bf16 %v3445_v30, %v3442_v45 }
 0x4a7   : > { %4338 = vrot.lane.b32.xlu0 %v4337_v12, %s4438_s26  ;;  %4343 = vrot.lane.b32.xlu1 %v4342_v51, %s4438_s26 }
 0x4ab   : > { %4348 = vrot.lane.b32.xlu0 %v5082_v36, %s4439_s12  ;;  %4353 = vrot.lane.b32.xlu1 %v5106_v59, %s4439_s12 }
 0x4af   : > { %4358 = vrot.lane.b32.xlu0 %v5100_v56, %s4439_s12  ;;  %4363 = vrot.lane.b32.xlu1 %v4362_v11, %s4440_s29  ;;  %v3883_v11 = vld [vmem:[%s5470_s6 + $0x18] sm:$0xff] }
 0x4b3   : > { %4368 = vrot.lane.b32.xlu0 %v4367_v4, %s4440_s29  ;;  %4373 = vrot.lane.b32.xlu1 %v4372_v17, %s4440_s29 }
 0x4b7   : > { %4378 = vrot.lane.b32.xlu0 %v4377_v8, %s4442_s14  ;;  %4383 = vrot.lane.b32.xlu1 %v4382_v31, %s4442_s14 }
 0x4bb   : > { %4388 = vrot.lane.b32.xlu0 %v4387_v39, %s4442_s14  ;;  %4393 = vrot.lane.b32.xlu1 %v5082_v36, %s4443_s15 }
 0x4bf   : > { %4398 = vrot.lane.b32.xlu0 %v5106_v59, %s4443_s15  ;;  %4403 = vrot.lane.b32.xlu1 %v5100_v56, %s4443_s15 }
 0x4c3   : > { %4408 = vrot.lane.b32.xlu0 %v4407_v37, %s4444_s16  ;;  %4413 = vrot.lane.b32.xlu1 %v4412_v29, %s4444_s16 }
 0x4c7   : > { %4418 = vrot.lane.b32.xlu0 %v4417_v33, %s4444_s16  ;;  %3563 = vperm.xlu1 %4181, %v3560_v44  }
 0x509   : > { %v4304_v35 = vpop.permute.xlu1 %4303 }
 0x50a   : > { %v4306_v36 = vunpack.i.h.bf16 %v4304_v35  ;;  %v4305_v40 = vunpack.i.l.bf16 %v4304_v35 }
 0x50c   : > { %v2589_v41 = vsel %vm483_vm11, %v4305_v40, %v4306_v36 }
 0x50d   : > { %v4314_v49 = vpop.permute.xlu1 %4313  ;;  %v4309_v42 = vpop.permute.xlu0 %4308 }
 0x50e   : > { %v4316_v23 = vunpack.i.h.bf16 %v4314_v49  ;;  %v4315_v54 = vunpack.i.l.bf16 %v4314_v49  ;;  %v4311_v56 = vunpack.i.h.bf16 %v4309_v42  ;;  %v4310_v57 = vunpack.i.l.bf16 %v4309_v42  ;;  %v3889_v42 = vld [vmem:[%s5470_s6 + $0x28] sm:$0xff] }
 0x510   : > { %v2588_v59 = vsel %vm483_vm11, %v4315_v54, %v4305_v40  ;;  %v2590_v43 = vsel %vm483_vm11, %v4316_v23, %v4310_v57  ;;  %v2591_v60 = vsel %vm483_vm11, %v4310_v57, %v4311_v56 }
 0x511   : > { %v4003_v61 = vpack.c.bf16 %v2590_v43, %v2588_v59  ;;  %v4319_v58 = vpop.permute.xlu0 %4318  ;;  %v4324_v62 = vpop.permute.xlu1 %4323  ;;  %v4001_v63 = vpack.c.bf16 %v2591_v60, %v2589_v41  ;;  %v3892_v41 = vld [vmem:[%s5470_s6 + $0x30] sm:$0xff] }
 0x512   : > { %v4321_v6 = vunpack.i.h.bf16 %v4319_v58  ;;  %v4320_v7 = vunpack.i.l.bf16 %v4319_v58  ;;  %v4326_v21 = vunpack.i.h.bf16 %v4324_v62  ;;  %v4325_v19 = vunpack.i.l.bf16 %v4324_v62 }
 0x513   : > { %4002 = vmatprep.subr.bf16.mxu0 %v4001_v63 }
 0x514   : > { %4004 = vmatpush1.bf16.msra.mxu0 %v4003_v61  ;;  %v2786_v0 = vsel %vm688_vm6, %v4320_v7, %v4321_v6  ;;  %v2788_v48 = vsel %vm688_vm6, %v4325_v19, %v4326_v21 }
 0x515   : > { %v4329_v10 = vpop.permute.xlu0 %4328  ;;  %v4334_v13 = vpop.permute.xlu1 %4333  ;;  %4006 = vmatprep.subr.bf16.mxu0 %v4005_v25  ;;  %v4009_v51 = vpack.c.bf16 %v2788_v48, %v2786_v0  ;;  %v3893_v48 = vld [vmem:[%s5470_s6 + $0x38] sm:$0xff] }
 0x516   : > { %v4331_v14 = vunpack.i.h.bf16 %v4329_v10  ;;  %v4330_v12 = vunpack.i.l.bf16 %v4329_v10  ;;  %v4336_v24 = vunpack.i.h.bf16 %v4334_v13  ;;  %v4335_v53 = vunpack.i.l.bf16 %v4334_v13 }
 0x517   : > { %3884 = vmatmul.mubr.msk.f32.vlgmr.msra.gmra.mrb[4].mxu0 %vm784_vm2, %v3882_v9 }
 0x518   : > { %4008 = vmatpush1.bf16.msra.mxu0 %v4007_v52  ;;  %2672 = vmatprep.mubr.f32.mxu0 %v4436_v15  ;;  %v2785_v55 = vsel %vm688_vm6, %v4330_v12, %v4320_v7  ;;  %v2787_v1 = vsel %vm688_vm6, %v4331_v14, %v4325_v19  ;;  %v2904_v47 = vsel %vm804_vm8, %v4335_v53, %v4336_v24  ;;  %v3896_v12 = vld [vmem:[%s5470_s6 + $0x40] sm:$0xff] }
 0x519   : > { %v4339_v50 = vpop.permute.xlu0 %4338  ;;  %v4344_v20 = vpop.permute.xlu1 %4343  ;;  %4010 = vmatprep.subr.bf16.mxu0 %v4009_v51  ;;  %v4011_v4 = vpack.c.bf16 %v2787_v1, %v2785_v55 }
 0x51a   : > { %v4341_v46 = vunpack.i.h.bf16 %v4339_v50  ;;  %v4340_v25 = vunpack.i.l.bf16 %v4339_v50  ;;  %v4346_v17 = vunpack.i.h.bf16 %v4344_v20  ;;  %v4345_v32 = vunpack.i.l.bf16 %v4344_v20 }
 0x51b   : > { %3885 = vmatmul.mubr.msk.f32.gmra.mrb[6].mxu0 %vm784_vm2, %v3883_v11 }
 0x51c   : > { %2747 = vmatprep.mubr.f32.mxu0 %v4436_v15  ;;  %v2906_v52 = vsel %vm804_vm8, %v4340_v25, %v4341_v46  ;;  %v2905_v22 = vsel %vm804_vm8, %v4346_v17, %v4340_v25  ;;  %v2903_v27 = vsel %vm804_vm8, %v4345_v32, %v4335_v53 }
 0x51d   : > { %v4349_v2 = vpop.permute.xlu0 %4348  ;;  %v4354_v3 = vpop.permute.xlu1 %4353  ;;  %v4013_v34 = vpack.c.bf16 %v2906_v52, %v2904_v47  ;;  %v4015_v44 = vpack.c.bf16 %v2905_v22, %v2903_v27 }
 0x51e   : > { %v4351_v5 = vunpack.i.h.bf16 %v4349_v2  ;;  %v4350_v8 = vunpack.i.l.bf16 %v4349_v2  ;;  %v4356_v31 = vunpack.i.h.bf16 %v4354_v3  ;;  %v4355_v16 = vunpack.i.l.bf16 %v4354_v3 }
 0x51f   : > { %3886 = vmatmul.mubr.msk.f32.vlgmr.msra.gmra.mrb[4].mxu0 %vm784_vm2, %v2567_v26  ;;  %v3897_v26 = vld [vmem:[%s5470_s6 + $0x48] sm:$0xff] }
 0x520   : > { %4012 = vmatpush1.bf16.msra.mxu0 %v4011_v4  ;;  %2753 = vmatprep.mubr.f32.mxu0 %v4436_v15  ;;  %v3010_v37 = vsel %vm905_vm9, %v4350_v8, %v4351_v5  ;;  %v3012_v29 = vsel %vm905_vm9, %v4355_v16, %v4356_v31 }
 0x521   : > { %4014 = vmatprep.subr.bf16.mxu0 %v4013_v34  ;;  %v4359_v39 = vpop.permute.xlu0 %4358  ;;  %v4364_v38 = vpop.permute.xlu1 %4363  ;;  %v4017_v36 = vpack.c.bf16 %v3012_v29, %v3010_v37  ;;  %v3900_v34 = vld [vmem:[%s5470_s6 + $0x50] sm:$0xff] }
 0x522   : > { %v4361_v33 = vunpack.i.h.bf16 %v4359_v39  ;;  %v4360_v35 = vunpack.i.l.bf16 %v4359_v39  ;;  %v4366_v54 = vunpack.i.h.bf16 %v4364_v38  ;;  %v4365_v56 = vunpack.i.l.bf16 %v4364_v38 }
 0x523   : > { %3887 = vmatmul.mubr.msk.f32.gmra.mrb[8].mxu0 %vm784_vm2, %v2568_v18 }
 0x524   : > { %2863 = vmatprep.mubr.f32.mxu0 %v4436_v15  ;;  %v3009_v57 = vsel %vm905_vm9, %v4360_v35, %v4350_v8  ;;  %v3011_v59 = vsel %vm905_vm9, %v4361_v33, %v4355_v16  ;;  %v3128_v58 = vsel %vm1021_vm10, %v4365_v56, %v4366_v54 }
 0x525   : > { %v4369_v30 = vpop.permute.xlu0 %4368  ;;  %v4374_v45 = vpop.permute.xlu1 %4373  ;;  %v4019_v61 = vpack.c.bf16 %v3011_v59, %v3009_v57  ;;  %v3909_v59 = vld [vmem:[%s5470_s6 + $0x78] sm:$0xff] }
 0x526   : > { %v4371_v40 = vunpack.i.h.bf16 %v4369_v30  ;;  %v4370_v49 = vunpack.i.l.bf16 %v4369_v30  ;;  %v4376_v62 = vunpack.i.h.bf16 %v4374_v45  ;;  %v4375_v63 = vunpack.i.l.bf16 %v4374_v45  ;;  %v3904_v45 = vld [vmem:[%s5470_s6 + $0x60] sm:$0xff] }
 0x527   : > { %3890 = vmatmul.mubr.msk.f32.vlgmr.msra.gmra.mrb[4].mxu0 %vm784_vm2, %v3888_v28  ;;  %v3901_v28 = vld [vmem:[%s5470_s6 + $0x58] sm:$0xff] }
 0x528   : > { %4016 = vmatpush1.bf16.msra.mxu0 %v4015_v44  ;;  %2869 = vmatprep.mubr.f32.mxu0 %v4436_v15  ;;  %v3130_v60 = vsel %vm1021_vm10, %v4370_v49, %v4371_v40  ;;  %v3129_v13 = vsel %vm1021_vm10, %v4376_v62, %v4370_v49  ;;  %v3127_v14 = vsel %vm1021_vm10, %v4375_v63, %v4365_v56  ;;  %v3908_v56 = vld [vmem:[%s5470_s6 + $0x70] sm:$0xff]  ;;  %v3571_v62 = vld [vmem:[%s5472_s8 + $0x8] sm:$0xff] }
 0x529   : > { %4018 = vmatprep.subr.bf16.mxu0 %v4017_v36  ;;  %v4379_v23 = vpop.permute.xlu0 %4378  ;;  %v4384_v43 = vpop.permute.xlu1 %4383  ;;  %v4021_v7 = vpack.c.bf16 %v3130_v60, %v3128_v58  ;;  %v4023_v11 = vpack.c.bf16 %v3129_v13, %v3127_v14  ;;  %v3587_v60 = vld [vmem:[%s5472_s8 + $0x88] sm:$0xff]  ;;  %v3570_v58 = vld [vmem:[%s5472_s8] sm:$0xff] }
 0x52a   : > { %v4381_v21 = vunpack.i.h.bf16 %v4379_v23  ;;  %v4380_v19 = vunpack.i.l.bf16 %v4379_v23  ;;  %v4386_v9 = vunpack.i.h.bf16 %v4384_v43  ;;  %v4385_v0 = vunpack.i.l.bf16 %v4384_v43  ;;  %v3912_v43 = vld [vmem:[%s5470_s6 + $0x80] sm:$0xff] }
 0x52b   : > { %3891 = vmatmul.mubr.msk.f32.gmra.mrb[10].mxu0 %vm784_vm2, %v3889_v42  ;;  %v3905_v42 = vld [vmem:[%s5470_s6 + $0x68] sm:$0xff]  ;;  %v4039_v63 = vpack.c.bf16 %v3571_v62, %v3570_v58  ;;  %v3574_v14 = vld [vmem:[%s5472_s8 + $0x20] sm:$0xff] }
 0x52c   : > { %2981 = vmatprep.mubr.f32.mxu0 %v4436_v15  ;;  %v3246_v51 = vsel %vm1137_vm12, %v4380_v19, %v4381_v21  ;;  %v3248_v24 = vsel %vm1137_vm12, %v4385_v0, %v4386_v9  ;;  %v3572_v21 = vld [vmem:[%s5472_s8 + $0x10] sm:$0xff]  ;;  %v3573_v9 = vld [vmem:[%s5472_s8 + $0x18] sm:$0xff] }
 0x52d   : > { %v4389_v6 = vpop.permute.xlu0 %4388  ;;  %v4394_v10 = vpop.permute.xlu1 %4393  ;;  %v4025_v25 = vpack.c.bf16 %v3248_v24, %v3246_v51  ;;  %v3592_v24 = vld [vmem:[%s5472_s8 + $0xb0] sm:$0xff] }
 0x52e   : > { %v4391_v50 = vunpack.i.h.bf16 %v4389_v6  ;;  %v4390_v20 = vunpack.i.l.bf16 %v4389_v6  ;;  %v4396_v47 = vunpack.i.h.bf16 %v4394_v10  ;;  %v4395_v52 = vunpack.i.l.bf16 %v4394_v10  ;;  %v3588_v6 = vld [vmem:[%s5472_s8 + $0x90] sm:$0xff] }
 0x52f   : > { %3894 = vmatmul.mubr.msk.f32.vlgmr.msra.gmra.mrb[4].mxu0 %vm784_vm2, %v3892_v41  ;;  %v3586_v41 = vld [vmem:[%s5472_s8 + $0x80] sm:$0xff]  ;;  %v4043_v10 = vpack.c.bf16 %v3573_v9, %v3572_v21  ;;  %v4446_v21 = vmov 0.0|0.0   ;;  %v3673_v9 = vld [vmem:[%s5473_s9 + $0x8] sm:$0xff] }
 0x530   : > { %4020 = vmatpush1.bf16.msra.mxu0 %v4019_v61  ;;  %2987 = vmatprep.mubr.f32.mxu0 %v4436_v15  ;;  %v3245_v2 = vsel %vm1137_vm12, %v4390_v20, %v4380_v19  ;;  %v3247_v3 = vsel %vm1137_vm12, %v4391_v50, %v4385_v0  ;;  %v3352_v8 = vsel %vm1238_vm13, %v4395_v52, %v4396_v47  ;;  %v3590_v0 = vld [vmem:[%s5472_s8 + $0xa0] sm:$0xff]  ;;  %v3577_v20 = vld [vmem:[%s5472_s8 + $0x38] sm:$0xff]  ;;  %v3579_v47 = vld [vmem:[%s5472_s8 + $0x48] sm:$0xff] }
 0x531   : > { %4022 = vmatprep.subr.bf16.mxu0 %v4021_v7  ;;  %v4399_v53 = vpop.permute.xlu0 %4398  ;;  %v4404_v46 = vpop.permute.xlu1 %4403  ;;  %v4027_v5 = vpack.c.bf16 %v3247_v3, %v3245_v2  ;;  %v4037_v61 = vpack.c.bf16 %v3587_v60, %v3586_v41  ;;  %v3589_v7 = vld [vmem:[%s5472_s8 + $0x98] sm:$0xff]  ;;  %v3596_v2 = vld [vmem:[%s5472_s8 + $0xd0] sm:$0xff] }
 0x532   : > { %v4401_v55 = vunpack.i.h.bf16 %v4399_v53  ;;  %v4400_v1 = vunpack.i.l.bf16 %v4399_v53  ;;  %v4406_v31 = vunpack.i.h.bf16 %v4404_v46  ;;  %v4405_v16 = vunpack.i.l.bf16 %v4404_v46  ;;  %v3593_v53 = vld [vmem:[%s5472_s8 + $0xb8] sm:$0xff]  ;;  %v3594_v46 = vld [vmem:[%s5472_s8 + $0xc0] sm:$0xff] }
 0x533   : > { %3895 = vmatmul.mubr.msk.f32.gmra.mrb[12].mxu0 %vm784_vm2, %v3893_v48  ;;  %4038 = vmatprep.subr.bf16.mxu1 %v4037_v61  ;;  %v4041_v19 = vpack.c.bf16 %v3589_v7, %v3588_v6  ;;  %v3591_v48 = vld [vmem:[%s5472_s8 + $0xa8] sm:$0xff]  ;;  %v4049_v50 = vpack.c.bf16 %v3593_v53, %v3592_v24  ;;  %v3597_v3 = vld [vmem:[%s5472_s8 + $0xd8] sm:$0xff]  ;;  %v3674_v24 = vld [vmem:[%s5474_s10] sm:$0x1] }
 0x534   : > { %3087 = vmatprep.mubr.f32.mxu0 %v4436_v15  ;;  %v3354_v4 = vsel %vm1238_vm13, %v4400_v1, %v4401_v55  ;;  %v3353_v37 = vsel %vm1238_vm13, %v4406_v31, %v4400_v1  ;;  %v3351_v29 = vsel %vm1238_vm13, %v4405_v16, %v4395_v52  ;;  %4040 = vmatpush3.bf16.msra.mxu1 %v4039_v63  ;;  %v3582_v16 = vld [vmem:[%s5472_s8 + $0x60] sm:$0xff] }
 0x535   : > { %v4409_v17 = vpop.permute.xlu0 %4408  ;;  %v4414_v32 = vpop.permute.xlu1 %4413  ;;  %v4029_v18 = vpack.c.bf16 %v3354_v4, %v3352_v8  ;;  %v4031_v35 = vpack.c.bf16 %v3353_v37, %v3351_v29  ;;  %4042 = vmatprep.subr.bf16.mxu1 %v4041_v19  ;;  %v4045_v13 = vpack.c.bf16 %v3591_v48, %v3590_v0  ;;  %v4057_v4 = vpack.c.bf16 %v3597_v3, %v3596_v2  ;;  %v3599_v8 = vld [vmem:[%s5472_s8 + $0xe8] sm:$0xff]  ;;  %v3585_v37 = vld [vmem:[%s5472_s8 + $0x78] sm:$0xff]  ;;  %v3672_v19 = vld [vmem:[%s5473_s9] sm:$0xff] }
 0x536   : > { %v4411_v39 = vunpack.i.h.bf16 %v4409_v17  ;;  %v4410_v38 = vunpack.i.l.bf16 %v4409_v17  ;;  %v4416_v22 = vunpack.i.h.bf16 %v4414_v32  ;;  %v4415_v27 = vunpack.i.l.bf16 %v4414_v32  ;;  %v3581_v17 = vld [vmem:[%s5472_s8 + $0x58] sm:$0xff]  ;;  %v3913_v48 = vld [vmem:[%s5470_s6 + $0x88] sm:$0xff] }
 0x537   : > { %3898 = vmatmul.mubr.msk.f32.vlgmr.msra.gmra.mrb[4].mxu0 %vm784_vm2, %v3896_v12  ;;  %v3575_v12 = vld [vmem:[%s5472_s8 + $0x28] sm:$0xff]  ;;  %v4070_v0 = vpack.c.bf16 %v3673_v9, %v3672_v19 }
 0x538   : > { %4024 = vmatpush1.bf16.msra.mxu0 %v4023_v11  ;;  %3093 = vmatprep.mubr.f32.mxu0 %v4436_v15  ;;  %v3470_v44 = vsel %vm1354_vm14, %v4410_v38, %v4411_v39  ;;  %v3472_v33 = vsel %vm1354_vm14, %v4415_v27, %v4416_v22  ;;  %v4047_v51 = vpack.c.bf16 %v3575_v12, %v3574_v14  ;;  %v3576_v11 = vld [vmem:[%s5472_s8 + $0x30] sm:$0xff]  ;;  %v3601_v22 = vld [vmem:[%s5472_s8 + $0xf8] sm:$0xff] }
 0x539   : > { %4026 = vmatprep.subr.bf16.mxu0 %v4025_v25  ;;  %v4419_v30 = vpop.permute.xlu0 %4418  ;;  %v4033_v49 = vpack.c.bf16 %v3472_v33, %v3470_v44  ;;  %4044 = vmatpush3.bf16.msra.mxu1 %v4043_v10  ;;  %v3595_v25 = vld [vmem:[%s5472_s8 + $0xc8] sm:$0xff]  ;;  %v4051_v55 = vpack.c.bf16 %v3577_v20, %v3576_v11 }
 0x53a   : > { %v4421_v36 = vunpack.i.h.bf16 %v4419_v30  ;;  %v4420_v40 = vunpack.i.l.bf16 %v4419_v30  ;;  %4046 = vmatprep.subr.bf16.mxu1 %v4045_v13  ;;  %v4053_v1 = vpack.c.bf16 %v3595_v25, %v3594_v46 }
 0x53b   : > { %3899 = vmatmul.mubr.msk.f32.gmra.mrb[14].mxu0 %vm784_vm2, %v3897_v26  ;;  %v3578_v26 = vld [vmem:[%s5472_s8 + $0x40] sm:$0xff] }
 0x53c   : > { %3205 = vmatprep.mubr.f32.mxu0 %v4436_v15  ;;  %v3469_v23 = vsel %vm1354_vm14, %v4420_v40, %v4410_v38  ;;  %v3471_v54 = vsel %vm1354_vm14, %v4421_v36, %v4415_v27  ;;  %v4055_v52 = vpack.c.bf16 %v3579_v47, %v3578_v26  ;;  %v3600_v38 = vld [vmem:[%s5472_s8 + $0xf0] sm:$0xff] }
 0x53d   : > { %v4035_v57 = vpack.c.bf16 %v3471_v54, %v3469_v23  ;;  %4048 = vmatpush3.bf16.msra.mxu1 %v4047_v51  ;;  %v3584_v27 = vld [vmem:[%s5472_s8 + $0x70] sm:$0xff] }
 0x53e   : > { %4050 = vmatprep.subr.bf16.mxu1 %v4049_v50  ;;  %v4067_v29 = vpack.c.bf16 %v3585_v37, %v3584_v27  ;;  %v3749_v50 = vld [vmem:[%s5475_s11] sm:$0x1] }
 0x53f   : > { %3902 = vmatmul.mubr.msk.f32.vlgmr.msra.gmra.mrb[4].mxu0 %vm784_vm2, %v3900_v34  ;;  %v3580_v34 = vld [vmem:[%s5472_s8 + $0x50] sm:$0xff] }
 0x540   : > { %4028 = vmatpush1.bf16.msra.mxu0 %v4027_v5  ;;  %3211 = vmatprep.mubr.f32.mxu0 %v4436_v15  ;;  %v4059_v32 = vpack.c.bf16 %v3581_v17, %v3580_v34  ;;  %v3598_v5 = vld [vmem:[%s5472_s8 + $0xe0] sm:$0xff] }
 0x541   : > { %4030 = vmatprep.subr.bf16.mxu0 %v4029_v18  ;;  %4052 = vmatpush3.bf16.msra.mxu1 %v4051_v55  ;;  %v4061_v31 = vpack.c.bf16 %v3599_v8, %v3598_v5  ;;  %v3583_v18 = vld [vmem:[%s5472_s8 + $0x68] sm:$0xff]  ;;  %v3755_v55 = vld [vmem:[#allocation2] sm:$0x1] }
 0x542   : > { %4054 = vmatprep.subr.bf16.mxu1 %v4053_v1  ;;  %v4063_v39 = vpack.c.bf16 %v3583_v18, %v3582_v16 }
 0x543   : > { %3903 = vmatmul.mubr.msk.f32.gmra.mrb[16].mxu0 %vm784_vm2, %v3901_v28  ;;  %v4065_v28 = vpack.c.bf16 %v3601_v22, %v3600_v38 }
 0x544   : > { %3323 = vmatprep.mubr.f32.mxu0 %v4436_v15 }
 0x545   : > { %4056 = vmatpush3.bf16.msra.mxu1 %v4055_v52 }
 0x546   : > { %4058 = vmatprep.subr.bf16.mxu1 %v4057_v4  ;;  %v3564_v60 = vpop.permute.xlu1 %3563 }
 0x547   : > { %3906 = vmatmul.mubr.msk.f32.vlgmr.msra.gmra.mrb[4].mxu0 %vm784_vm2, %v3904_v45 }
 0x548   : > { %4032 = vmatpush1.bf16.msra.mxu0 %v4031_v35  ;;  %3329 = vmatprep.mubr.f32.mxu0 %v4436_v15 }
 0x549   : > { %4034 = vmatprep.subr.bf16.mxu0 %v4033_v49  ;;  %4060 = vmatpush3.bf16.msra.mxu1 %v4059_v32 }
 0x54a   : > { %4062 = vmatprep.subr.bf16.mxu1 %v4061_v31 }
 0x54b   : > { %3907 = vmatmul.mubr.msk.f32.gmra.mrb[18].mxu0 %vm784_vm2, %v3905_v42 }
 0x54c   : > { %3429 = vmatprep.mubr.f32.mxu0 %v4436_v15 }
 0x54d   : > { %4064 = vmatpush3.bf16.msra.mxu1 %v4063_v39 }
 0x54e   : > { %4066 = vmatprep.subr.bf16.mxu1 %v4065_v28 }
 0x54f   : > { %3910 = vmatmul.mubr.msk.f32.vlgmr.msra.gmra.mrb[4].mxu0 %vm784_vm2, %v3908_v56 }
 0x550   : > { %4036 = vmatpush1.bf16.msra.mxu0 %v4035_v57  ;;  %3435 = vmatprep.mubr.f32.mxu0 %v4436_v15 }
 0x551   : > { %4068 = vmatpush3.bf16.msra.mxu1 %v4067_v29 }
 0x552   : > { %4069 = vmatprep.subr.bf16.mxu1 %v4446_v21 }
 0x553   : > { %3911 = vmatmul.mubr.msk.f32.gmra.mrb[20].mxu0 %vm784_vm2, %v3909_v59 }
 0x554   : > { %3547 = vmatprep.mubr.f32.mxu0 %v4436_v15 }
 0x557   : > { %3914 = vmatmul.mubr.msk.f32.vlgmr.msra.gmra.mrb[4].mxu0 %vm784_vm2, %v3912_v43 }
 0x558   : > { %3553 = vmatprep.mubr.f32.mxu0 %v4436_v15 }
 0x55b   : > { %3915 = vmatmul.mubr.msk.f32.gmra.mrb[22].mxu0 %vm784_vm2, %v3913_v48 }
 0x5ee   : > { %v2674_v30 = vpop.f32.mrb[6].mxu0 }
 0x5ef   : > { %v2675_v45 = vpop.f32.mrb[7].mxu0 }
 0x5f6   : > { %v2755_v44 = vpop.f32.mrb[8].mxu0 }
 0x5f7   : > { %v2756_v33 = vpop.f32.mrb[9].mxu0 }
 0x5fe   : > { %v2871_v35 = vpop.f32.mrb[10].mxu0 }
 0x5ff   : > { %v2872_v36 = vpop.f32.mrb[11].mxu0 }
 0x606   : > { %v2989_v40 = vpop.f32.mrb[12].mxu0 }
 0x607   : > { %v2990_v49 = vpop.f32.mrb[13].mxu0 }
 0x60e   : > { %v3095_v42 = vpop.f32.mrb[14].mxu0 }
 0x60f   : > { %v3096_v23 = vpop.f32.mrb[15].mxu0 }
 0x616   : > { %v3213_v54 = vpop.f32.mrb[16].mxu0 }
 0x617   : > { %v3214_v56 = vpop.f32.mrb[17].mxu0 }
 0x61e   : > { %v3331_v57 = vpop.f32.mrb[18].mxu0 }
 0x61f   : > { %v3332_v59 = vpop.f32.mrb[19].mxu0 }
 0x626   : > { %v3437_v43 = vpop.f32.mrb[20].mxu0 }
 0x627   : > { %v3438_v41 = vpop.f32.mrb[21].mxu0 }
 0x62a   : > { %v3549_v61 = vpop.f32.mrb[4].mxu0 }
 0x62b   : > { %v3566_v58 = vadd.f32 %v3564_v60, %v3549_v61  ;;  %v3551_v62 = vpop.f32.mrb[5].mxu0 }
 0x62c   : > { %v3567_v63 = vadd.f32 %v3564_v60, %v3551_v62 }
 0x62d   : > { %v3568_v7 = vmax.f32 %v3566_v58, 0.0 }
 0x62e   : > { %v3569_v6 = vmax.f32 %v3567_v63, 0.0  ;;  %v3555_v12 = vpop.f32.mrb[22].mxu0 }
 0x62f   : > { %v3556_v51 = vpop.f32.mrb[23].mxu0 }
 0x630   : > { %3666 = vmatprep.mubr.f32.mxu1 %v3569_v6 }
 0x631   : > { %3667 = vmatmul.mubr.f32.vlgmr.msra.gmra.mrb[8].mxu1 %v3568_v7 }
 0x632   : > { %3962 = vmatprep.mubr.msk.f32.mxu1 %vm4447_vm15, %v4436_v15  ;;  %4071 = vmatpush3.bf16.msra.mxu1 %v4070_v0 }
 0x704   : > { %v3952_v10 = vpop.f32.mrb[8].mxu1 }
 0x705   : > { %v3953_v13 = vpop.f32.mrb[9].mxu1 }
 0x706   : > { %v3954_v14 = vadd.f32 %v3953_v13, %v3952_v10 }
 0x708   : > { %3963 = vmatmul.mubr.msk.f32.vlgmr.msra.gmra.mrb[10].mxu1 %vm784_vm2, %v3954_v14 }
 0x7db   : > { %v3744_v15 = vpop.f32.mrb[10].mxu1 }
 0x7dc   : > { %v3745_v53 = vadd.f32 %v3744_v15, %v3674_v24  ;;  %v3964_v11 = vpop.f32.mrb[11].mxu1 }
 0x7de   : > { %v3748_v20 = vmax.f32 %v3745_v53, 0.0 }
 0x7e0   : > { %v3750_v46 = vmul.f32 %v3749_v50, %v3748_v20 }
 0x7e2   : > { %v3752_v25 = vsel %vm3751_vm0, %v3750_v46, 0.0 }
 0x7e3   : > { %3753 = vadd.xlane.f32.xlu0 %v3752_v25 }
 0x870   : > { %v3754_v1 = vpop.xlane.xlu0 %3753 }
 0x871   : > { %v3756_v26 = vadd.f32 %v3755_v55, %v3754_v1 }
 0x873   : > { %3758 = vst.msk [vmem:[%s438_s17] sm:$0x1] %vm3757_vm1, %v3756_v26 }
 0x874 PF: > { %s25_s27 = sadd.s32 1, %s4428_s27  }
 0x875   : > { %p22_p4 = scmp.ge.s32.totalorder %s25_s27, 4  }
 0x877   :  { %24 = sbr.rel (!%p22_p4) target bundleno = 3 (0x3), region = 127 }

</bundles_post_ra>
